<compile_context>
chip_gen: v6e
topology: v6e:2x2x1
jax: 0.10.0
libtpu: 0.0.40
codegen_flags: <defaults>
</compile_context>

<pallas_src>
import functools
import math

import jax
import jax.numpy as jnp
from jax.experimental import pallas as pl
from jax.experimental.pallas import tpu as pltpu


N_LAYERS = 24


# ---------------------------------------------------------------------------
# Fused kernel: Linear + gc1..gc24 residual chain + gc25 + log_softmax
# ---------------------------------------------------------------------------

def _fused_resgcn_kernel(
    x_ref, adj_ref, lw_ref, lin_b_ref, b1_ref,      # layer-0 inputs
    wcat_ref, bstack_ref,                            # packed hidden-layer weights [W | W25]
    w25_last_ref, b25_ref,                           # x24's W25 slice + padded bias
    out_ref,                                         # [n, nclass_pad] f32 (lane-dense)
    *, nhid, nclass, n_layers,
):
    bf = jnp.bfloat16
    f32 = jnp.float32
    n = out_ref.shape[0]
    nclass_pad = out_ref.shape[1]

    adj = adj_ref[...]                               # bf16 [n, n], VMEM resident
    x = x_ref[...]                                   # bf16 [n, nfeat]

    # ---- layer 0: top-level Linear fused with gc1's support ----------------
    #   x @ [lin_w | w1]  -> one 256-wide MXU matmul
    xw = jnp.dot(x, lw_ref[...], preferred_element_type=f32)        # [n, 2*nhid]
    z = xw[:, :nhid] + lin_b_ref[...]
    support1 = xw[:, nhid:]
    agg1 = jnp.dot(adj, support1.astype(bf), preferred_element_type=f32)
    act0 = jnp.maximum(agg1 + b1_ref[...], 0.0) + z                  # x1, f32
    sup25_0 = jnp.zeros((n, nclass_pad), f32)

    # ---- layers 2..24: residual chain; x_l's gc25 contribution fused into
    #      layer (l+1)'s support matmul via the packed [W | W25] RHS ---------
    def body(l, carry):
        act, sup25 = carry
        act_bf = act.astype(bf)
        cat = jnp.dot(act_bf, wcat_ref[l - 1], preferred_element_type=f32)  # [n, nhid+pad]
        support = cat[:, :nhid]
        sup25 = sup25 + cat[:, nhid:]
        agg = jnp.dot(adj, support.astype(bf), preferred_element_type=f32)
        act = jnp.maximum(agg + bstack_ref[l - 1], 0.0) + act
        return act, sup25

    act, sup25 = jax.lax.fori_loop(1, n_layers, body, (act0, sup25_0))

    # x24 has no "next layer" to fuse with: standalone 128-wide (padded) dot.
    sup25 = sup25 + jnp.dot(act.astype(bf), w25_last_ref[...],
                            preferred_element_type=f32)

    # gc25 aggregate + log_softmax; padded lanes masked to -inf so the
    # row max / sum only see the real nclass logits.
    logits = jnp.dot(adj, sup25.astype(bf), preferred_element_type=f32) + b25_ref[...]
    lane = jax.lax.broadcasted_iota(jnp.int32, (n, nclass_pad), 1)
    logits = jnp.where(lane < nclass, logits, jnp.float32(-jnp.inf))
    m = jnp.max(logits, axis=1, keepdims=True)
    shifted = logits - m
    lse = jnp.log(jnp.sum(jnp.exp(shifted), axis=1, keepdims=True))
    out_ref[...] = shifted - lse


# ---------------------------------------------------------------------------
# pallas_call wrapper
# ---------------------------------------------------------------------------

@jax.jit
def resgcn25_forward(params, x, adj):
    n, nfeat = x.shape
    nhid = params["w1"].shape[1]
    nclass = params["b25"].shape[0]
    nclass_pad = max(128, ((nclass + 127) // 128) * 128)     # lane-dense gc25 path

    bf = jnp.bfloat16
    x_bf = x.astype(bf)
    adj_bf = adj.astype(bf)

    # layer-0 packing: [lin_w | w1] -> [nfeat, 2*nhid]
    lw_cat = jnp.concatenate([params["lin_w"], params["w1"]], axis=1).astype(bf)
    lin_b = params["lin_b"].reshape(1, nhid)                 # biases stay f32
    b1 = params["b1"].reshape(1, nhid)

    # gc25 packing: torch.cat order is (x24, x23, ..., x1), so x_i pairs with
    # W25 slice (24 - i).  Slice for x_l is fused into layer (l+1)'s weight.
    w25 = params["w25"].reshape(N_LAYERS, nhid, nclass)
    w25_pad = jnp.zeros((N_LAYERS, nhid, nclass_pad), jnp.float32)
    w25_pad = w25_pad.at[:, :, :nclass].set(w25)
    w25_rev = w25_pad[::-1]                                  # slices 23, 22, ..., 0
    w_cat = jnp.concatenate(
        [params["w_stack"], w25_rev[:N_LAYERS - 1]], axis=2).astype(bf)  # [23, nhid, nhid+pad]
    w25_last = w25_pad[0].astype(bf)                         # x24's slice
    b_stack = params["b_stack"].reshape(N_LAYERS - 1, 1, nhid)
    b25_pad = jnp.zeros((1, nclass_pad), jnp.float32).at[0, :nclass].set(params["b25"])

    c2 = lambda i: (0, 0)
    c3 = lambda i: (0, 0, 0)
    in_specs = [
        pl.BlockSpec((n, nfeat), c2),                        # x
        pl.BlockSpec((n, n), c2),                            # adj (VMEM resident)
        pl.BlockSpec((nfeat, 2 * nhid), c2),                 # [lin_w | w1]
        pl.BlockSpec((1, nhid), c2),                         # lin_b
        pl.BlockSpec((1, nhid), c2),                         # b1
        pl.BlockSpec((N_LAYERS - 1, nhid, nhid + nclass_pad), c3),  # packed [W | W25]
        pl.BlockSpec((N_LAYERS - 1, 1, nhid), c3),           # b_stack
        pl.BlockSpec((nhid, nclass_pad), c2),                # w25 slice for x24
        pl.BlockSpec((1, nclass_pad), c2),                   # b25 (padded)
    ]
    out_spec = pl.BlockSpec((n, nclass_pad), c2)

    flops = int(
        2 * n * nfeat * 2 * nhid                             # x @ [lin_w | w1]
        + (N_LAYERS - 1) * 2 * n * nhid * (nhid + nclass_pad)
        + N_LAYERS * 2 * n * n * nhid                        # adj @ support per layer
        + 2 * n * nhid * nclass_pad                          # x24 @ w25[0]
        + 2 * n * n * nclass_pad                             # final adj @ sup25
    )
    bytes_accessed = int(
        2 * (x_bf.size + adj_bf.size + lw_cat.size + w_cat.size + w25_last.size)
        + 4 * (lin_b.size + b1.size + b_stack.size + b25_pad.size + n * nclass_pad)
    )
    cost = pl.CostEstimate(flops=flops,
                           transcendentals=int(n * (nclass_pad + 1)),
                           bytes_accessed=bytes_accessed)

    kernel = functools.partial(_fused_resgcn_kernel,
                               nhid=nhid, nclass=nclass, n_layers=N_LAYERS)

    out_pad = pl.pallas_call(
        kernel,
        out_shape=jax.ShapeDtypeStruct((n, nclass_pad), jnp.float32),
        grid=(1,),                                           # single step: all operands VMEM-resident
        in_specs=in_specs,
        out_specs=out_spec,
        compiler_params=pltpu.CompilerParams(
            dimension_semantics=("arbitrary",),
            vmem_limit_bytes=32 * 1024 * 1024,               # <4 MiB used; safe on v5e/v6e/v7x
        ),
        cost_estimate=cost,
    )(x_bf, adj_bf, lw_cat, lin_b, b1, w_cat, b_stack, w25_last, b25_pad)

    return out_pad[:, :nclass]                               # drop padded lanes


# ---------------------------------------------------------------------------
# Matched-precision pure-JAX reference (bf16 matmul inputs, f32 accumulation)
# ---------------------------------------------------------------------------

def resgcn25_reference(params, x, adj):
    bf = jnp.bfloat16

    def dot(a, b):
        return jnp.dot(a.astype(bf), b.astype(bf), preferred_element_type=jnp.float32)

    nhid = params["w1"].shape[1]
    nclass = params["b25"].shape[0]
    w25 = params["w25"].reshape(N_LAYERS, nhid, nclass)

    z = dot(x, params["lin_w"]) + params["lin_b"][None, :]
    act = jnp.maximum(dot(adj, dot(x, params["w1"])) + params["b1"][None, :], 0.0) + z
    sup25 = dot(act, w25[N_LAYERS - 1])                 # x1 pairs with the LAST w25 slice
    for i in range(N_LAYERS - 1):
        support = dot(act, params["w_stack"][i])
        act = jnp.maximum(dot(adj, support) + params["b_stack"][i][None, :], 0.0) + act
        sup25 = sup25 + dot(act, w25[N_LAYERS - 2 - i])
    # TODO(synk): F.dropout is identity at inference (training=False); no RNG applied.
    logits = dot(adj, sup25) + params["b25"][None, :]
    return jax.nn.log_softmax(logits, axis=1)


# ---------------------------------------------------------------------------
# Parameter init (deterministic, mirrors the PyTorch uniform init ranges)
# ---------------------------------------------------------------------------

def init_params(key, nfeat, nhid, nclass):
    ks = jax.random.split(key, 8)
    stdv_h = 1.0 / math.sqrt(nhid)
    stdv_c = 1.0 / math.sqrt(nclass)

    def u(k, shape, s):
        return jax.random.uniform(k, shape, jnp.float32, minval=-s, maxval=s)

    return {
        "lin_w": u(ks[0], (nfeat, nhid), stdv_h),                 # top-level Linear
        "lin_b": u(ks[1], (nhid,), stdv_h),
        "w1": u(ks[2], (nfeat, nhid), stdv_h),                    # gc1
        "b1": u(ks[3], (nhid,), stdv_h),
        "w_stack": u(ks[4], (N_LAYERS - 1, nhid, nhid), stdv_h),  # gc2..gc24
        "b_stack": u(ks[5], (N_LAYERS - 1, nhid), stdv_h),
        "w25": u(ks[6], (N_LAYERS * nhid, nclass), stdv_c),       # gc25
        "b25": u(ks[7], (nclass,), stdv_c),
    }


# ---------------------------------------------------------------------------
# Demo
# ---------------------------------------------------------------------------

if __name__ == "__main__":
    key = jax.random.PRNGKey(0)
    k_param, k_x, k_adj = jax.random.split(key, 3)

    N, NFEAT, NHID, NCLASS = 128, 64, 128, 16   # nhid=128 keeps lanes dense

    params = init_params(k_param, NFEAT, NHID, NCLASS)

    x = jax.random.normal(k_x, (N, NFEAT), jnp.float32)
    # symmetric, row-normalized dense adjacency, deterministic
    a = (jax.random.uniform(k_adj, (N, N)) > 0.5).astype(jnp.float32)
    a = a + a.T + jnp.eye(N, dtype=jnp.float32)
    adj = a / jnp.sum(a, axis=1, keepdims=True)

    out = resgcn25_forward(params, x, adj)
    jax.block_until_ready(out)

    assert out.shape == (N, NCLASS)
    assert bool(jnp.all(jnp.isfinite(out)))
    # log_softmax rows must normalize
    assert bool(jnp.allclose(jnp.sum(jnp.exp(out), axis=1), 1.0, atol=1e-3))

    ref = jax.jit(resgcn25_reference)(params, x, adj)
    max_err = float(jnp.max(jnp.abs(out - ref)))
    assert max_err < 2e-2, f"kernel/reference mismatch: max_err={max_err}"

    print("KERNEL_OK")
</pallas_src>

<mosaic_0001>
module attributes {stable_mosaic.version = 11 : i64} {
  func.func @_fused_resgcn_kernel(%arg0: i32, %arg1: memref<128x64xbf16, #tpu.memory_space<vmem>>, %arg2: memref<128x128xbf16, #tpu.memory_space<vmem>>, %arg3: memref<64x256xbf16, #tpu.memory_space<vmem>>, %arg4: memref<1x128xf32, #tpu.memory_space<vmem>>, %arg5: memref<1x128xf32, #tpu.memory_space<vmem>>, %arg6: memref<23x128x256xbf16, #tpu.memory_space<vmem>>, %arg7: memref<23x1x128xf32, #tpu.memory_space<vmem>>, %arg8: memref<128x128xbf16, #tpu.memory_space<vmem>>, %arg9: memref<1x128xf32, #tpu.memory_space<vmem>>, %arg10: memref<128x128xf32, #tpu.memory_space<vmem>>) attributes {dimension_semantics = [#tpu.dimension_semantics<arbitrary>], iteration_bounds = array<i64: 1>, scalar_prefetch = 0 : i64, scratch_operands = 0 : i64, tpu.core_type = #tpu.core_type<tc>, window_params = [{pipeline_mode = #tpu.pipeline_mode<synchronous>, transform_indices = @transform_0, window_bounds = array<i64: 128, 64>}, {pipeline_mode = #tpu.pipeline_mode<synchronous>, transform_indices = @transform_1, window_bounds = array<i64: 128, 128>}, {pipeline_mode = #tpu.pipeline_mode<synchronous>, transform_indices = @transform_2, window_bounds = array<i64: 64, 256>}, {pipeline_mode = #tpu.pipeline_mode<synchronous>, transform_indices = @transform_3, window_bounds = array<i64: 1, 128>}, {pipeline_mode = #tpu.pipeline_mode<synchronous>, transform_indices = @transform_4, window_bounds = array<i64: 1, 128>}, {pipeline_mode = #tpu.pipeline_mode<synchronous>, transform_indices = @transform_5, window_bounds = array<i64: 23, 128, 256>}, {pipeline_mode = #tpu.pipeline_mode<synchronous>, transform_indices = @transform_6, window_bounds = array<i64: 23, 1, 128>}, {pipeline_mode = #tpu.pipeline_mode<synchronous>, transform_indices = @transform_7, window_bounds = array<i64: 128, 128>}, {pipeline_mode = #tpu.pipeline_mode<synchronous>, transform_indices = @transform_8, window_bounds = array<i64: 1, 128>}, {pipeline_mode = #tpu.pipeline_mode<synchronous>, transform_indices = @transform_9, window_bounds = array<i64: 128, 128>}]} {
    %c0 = arith.constant 0 : index
    %c0_0 = arith.constant 0 : index
    %0 = vector.load %arg2[%c0, %c0_0] : memref<128x128xbf16, #tpu.memory_space<vmem>>, vector<128x128xbf16>
    %c0_1 = arith.constant 0 : index
    %c0_2 = arith.constant 0 : index
    %1 = vector.load %arg1[%c0_1, %c0_2] : memref<128x64xbf16, #tpu.memory_space<vmem>>, vector<128x64xbf16>
    %c0_3 = arith.constant 0 : index
    %c0_4 = arith.constant 0 : index
    %2 = vector.load %arg3[%c0_3, %c0_4] : memref<64x256xbf16, #tpu.memory_space<vmem>>, vector<64x256xbf16>
    %cst = arith.constant dense<0.000000e+00> : vector<128x256xf32>
    %3 = tpu.matmul %1, %2, %cst {dimension_numbers = #tpu.dot_dimension_numbers<[1], [0], [0], [1], [0, 0, 1, 1], [], []>} : vector<128x64xbf16>, vector<64x256xbf16>, vector<128x256xf32> -> vector<128x256xf32>
    %4 = vector.extract_strided_slice %3 {offsets = [0, 0], sizes = [128, 128], strides = [1, 1]} : vector<128x256xf32> to vector<128x128xf32>
    %c0_5 = arith.constant 0 : index
    %c0_6 = arith.constant 0 : index
    %5 = vector.load %arg4[%c0_5, %c0_6] : memref<1x128xf32, #tpu.memory_space<vmem>>, vector<1x128xf32>
    %6 = vector.broadcast %5 : vector<1x128xf32> to vector<128x128xf32>
    %7 = arith.addf %4, %6 : vector<128x128xf32>
    %8 = vector.extract_strided_slice %3 {offsets = [0, 128], sizes = [128, 128], strides = [1, 1]} : vector<128x256xf32> to vector<128x128xf32>
    %9 = arith.truncf %8 : vector<128x128xf32> to vector<128x128xbf16>
    %cst_7 = arith.constant dense<0.000000e+00> : vector<128x128xf32>
    %10 = tpu.matmul %0, %9, %cst_7 {dimension_numbers = #tpu.dot_dimension_numbers<[1], [0], [0], [1], [0, 0, 1, 1], [], []>} : vector<128x128xbf16>, vector<128x128xbf16>, vector<128x128xf32> -> vector<128x128xf32>
    %c0_8 = arith.constant 0 : index
    %c0_9 = arith.constant 0 : index
    %11 = vector.load %arg5[%c0_8, %c0_9] : memref<1x128xf32, #tpu.memory_space<vmem>>, vector<1x128xf32>
    %12 = vector.broadcast %11 : vector<1x128xf32> to vector<128x128xf32>
    %13 = arith.addf %10, %12 : vector<128x128xf32>
    %cst_10 = arith.constant 0.000000e+00 : f32
    %14 = vector.broadcast %cst_10 : f32 to vector<128x128xf32>
    %15 = arith.maximumf %13, %14 : vector<128x128xf32>
    %16 = arith.addf %15, %7 : vector<128x128xf32>
    %cst_11 = arith.constant 0.000000e+00 : f32
    %17 = vector.broadcast %cst_11 : f32 to vector<128x128xf32>
    %c1_i32 = arith.constant 1 : i32
    %c23_i32 = arith.constant 23 : i32
    %18 = arith.addi %c1_i32, %c23_i32 : i32
    %c1_i32_12 = arith.constant 1 : i32
    %19:2 = scf.for %arg11 = %c1_i32 to %18 step %c1_i32_12 iter_args(%arg12 = %16, %arg13 = %17) -> (vector<128x128xf32>, vector<128x128xf32>)  : i32 {
      %45 = arith.truncf %arg12 : vector<128x128xf32> to vector<128x128xbf16>
      %c1_i32_25 = arith.constant 1 : i32
      %46 = arith.subi %arg11, %c1_i32_25 : i32
      %47 = arith.index_cast %46 : i32 to index
      %c0_26 = arith.constant 0 : index
      %c0_27 = arith.constant 0 : index
      %48 = vector.load %arg6[%47, %c0_26, %c0_27] : memref<23x128x256xbf16, #tpu.memory_space<vmem>>, vector<1x128x256xbf16>
      %49 = vector.shape_cast %48 : vector<1x128x256xbf16> to vector<128x256xbf16>
      %cst_28 = arith.constant dense<0.000000e+00> : vector<128x256xf32>
      %50 = tpu.matmul %45, %49, %cst_28 {dimension_numbers = #tpu.dot_dimension_numbers<[1], [0], [0], [1], [0, 0, 1, 1], [], []>} : vector<128x128xbf16>, vector<128x256xbf16>, vector<128x256xf32> -> vector<128x256xf32>
      %51 = vector.extract_strided_slice %50 {offsets = [0, 0], sizes = [128, 128], strides = [1, 1]} : vector<128x256xf32> to vector<128x128xf32>
      %52 = vector.extract_strided_slice %50 {offsets = [0, 128], sizes = [128, 128], strides = [1, 1]} : vector<128x256xf32> to vector<128x128xf32>
      %53 = arith.addf %arg13, %52 : vector<128x128xf32>
      %54 = arith.truncf %51 : vector<128x128xf32> to vector<128x128xbf16>
      %cst_29 = arith.constant dense<0.000000e+00> : vector<128x128xf32>
      %55 = tpu.matmul %0, %54, %cst_29 {dimension_numbers = #tpu.dot_dimension_numbers<[1], [0], [0], [1], [0, 0, 1, 1], [], []>} : vector<128x128xbf16>, vector<128x128xbf16>, vector<128x128xf32> -> vector<128x128xf32>
      %c1_i32_30 = arith.constant 1 : i32
      %56 = arith.subi %arg11, %c1_i32_30 : i32
      %57 = arith.index_cast %56 : i32 to index
      %c0_31 = arith.constant 0 : index
      %c0_32 = arith.constant 0 : index
      %58 = vector.load %arg7[%57, %c0_31, %c0_32] : memref<23x1x128xf32, #tpu.memory_space<vmem>>, vector<1x1x128xf32>
      %59 = vector.shape_cast %58 : vector<1x1x128xf32> to vector<1x128xf32>
      %60 = vector.broadcast %59 : vector<1x128xf32> to vector<128x128xf32>
      %61 = arith.addf %55, %60 : vector<128x128xf32>
      %cst_33 = arith.constant 0.000000e+00 : f32
      %62 = vector.broadcast %cst_33 : f32 to vector<128x128xf32>
      %63 = arith.maximumf %61, %62 : vector<128x128xf32>
      %64 = arith.addf %63, %arg12 : vector<128x128xf32>
      scf.yield %64, %53 : vector<128x128xf32>, vector<128x128xf32>
    }
    %c23_i32_13 = arith.constant 23 : i32
    %20 = arith.truncf %19#0 : vector<128x128xf32> to vector<128x128xbf16>
    %c0_14 = arith.constant 0 : index
    %c0_15 = arith.constant 0 : index
    %21 = vector.load %arg8[%c0_14, %c0_15] : memref<128x128xbf16, #tpu.memory_space<vmem>>, vector<128x128xbf16>
    %cst_16 = arith.constant dense<0.000000e+00> : vector<128x128xf32>
    %22 = tpu.matmul %20, %21, %cst_16 {dimension_numbers = #tpu.dot_dimension_numbers<[1], [0], [0], [1], [0, 0, 1, 1], [], []>} : vector<128x128xbf16>, vector<128x128xbf16>, vector<128x128xf32> -> vector<128x128xf32>
    %23 = arith.addf %19#1, %22 : vector<128x128xf32>
    %24 = arith.truncf %23 : vector<128x128xf32> to vector<128x128xbf16>
    %cst_17 = arith.constant dense<0.000000e+00> : vector<128x128xf32>
    %25 = tpu.matmul %0, %24, %cst_17 {dimension_numbers = #tpu.dot_dimension_numbers<[1], [0], [0], [1], [0, 0, 1, 1], [], []>} : vector<128x128xbf16>, vector<128x128xbf16>, vector<128x128xf32> -> vector<128x128xf32>
    %c0_18 = arith.constant 0 : index
    %c0_19 = arith.constant 0 : index
    %26 = vector.load %arg9[%c0_18, %c0_19] : memref<1x128xf32, #tpu.memory_space<vmem>>, vector<1x128xf32>
    %27 = vector.broadcast %26 : vector<1x128xf32> to vector<128x128xf32>
    %28 = arith.addf %25, %27 : vector<128x128xf32>
    %29 = tpu.iota {dimensions = array<i32: 1>} : vector<128x128xi32>
    %c16_i32 = arith.constant 16 : i32
    %30 = vector.broadcast %c16_i32 : i32 to vector<128x128xi32>
    %31 = arith.cmpi slt, %29, %30 : vector<128x128xi32>
    %cst_20 = arith.constant 0xFF800000 : f32
    %32 = vector.broadcast %cst_20 : f32 to vector<128x128xf32>
    %33 = arith.select %31, %28, %32 : vector<128x128xi1>, vector<128x128xf32>
    %cst_21 = arith.constant dense<0xFF800000> : vector<128xf32>
    %34 = vector.multi_reduction <maximumf>, %33, %cst_21 [1] : vector<128x128xf32> to vector<128xf32>
    %35 = vector.shape_cast %34 : vector<128xf32> to vector<128x1xf32>
    %36 = vector.broadcast %35 : vector<128x1xf32> to vector<128x128xf32>
    %37 = arith.subf %33, %36 : vector<128x128xf32>
    %38 = math.exp %37 : vector<128x128xf32>
    %cst_22 = arith.constant dense<0.000000e+00> : vector<128xf32>
    %39 = vector.multi_reduction <add>, %38, %cst_22 [1] : vector<128x128xf32> to vector<128xf32>
    %40 = vector.shape_cast %39 : vector<128xf32> to vector<128x1xf32>
    %41 = math.log %40 : vector<128x1xf32>
    %42 = vector.broadcast %41 : vector<128x1xf32> to vector<128x128xf32>
    %43 = arith.subf %37, %42 : vector<128x128xf32>
    %c0_23 = arith.constant 0 : index
    %c0_24 = arith.constant 0 : index
    %44 = vector.load %arg10[%c0_23, %c0_24] : memref<128x128xf32, #tpu.memory_space<vmem>>, vector<128x128xf32>
    tpu.vector_store %arg10[%c0_23, %c0_24], %43 {strides = array<i32>} : memref<128x128xf32, #tpu.memory_space<vmem>>, vector<128x128xf32>,
    return
  }
  func.func @transform_0(%arg0: i32) -> (i32, i32) {
    %c0_i32 = arith.constant 0 : i32
    %c0_i32_0 = arith.constant 0 : i32
    %c0_i32_1 = arith.constant 0 : i32
    return %c0_i32, %c0_i32_0 : i32, i32
  }
  func.func @transform_1(%arg0: i32) -> (i32, i32) {
    %c0_i32 = arith.constant 0 : i32
    %c0_i32_0 = arith.constant 0 : i32
    %c0_i32_1 = arith.constant 0 : i32
    return %c0_i32, %c0_i32_0 : i32, i32
  }
  func.func @transform_2(%arg0: i32) -> (i32, i32) {
    %c0_i32 = arith.constant 0 : i32
    %c0_i32_0 = arith.constant 0 : i32
    %c0_i32_1 = arith.constant 0 : i32
    return %c0_i32, %c0_i32_0 : i32, i32
  }
  func.func @transform_3(%arg0: i32) -> (i32, i32) {
    %c0_i32 = arith.constant 0 : i32
    %c0_i32_0 = arith.constant 0 : i32
    %c0_i32_1 = arith.constant 0 : i32
    return %c0_i32, %c0_i32_0 : i32, i32
  }
  func.func @transform_4(%arg0: i32) -> (i32, i32) {
    %c0_i32 = arith.constant 0 : i32
    %c0_i32_0 = arith.constant 0 : i32
    %c0_i32_1 = arith.constant 0 : i32
    return %c0_i32, %c0_i32_0 : i32, i32
  }
  func.func @transform_5(%arg0: i32) -> (i32, i32, i32) {
    %c0_i32 = arith.constant 0 : i32
    %c0_i32_0 = arith.constant 0 : i32
    %c0_i32_1 = arith.constant 0 : i32
    %c0_i32_2 = arith.constant 0 : i32
    return %c0_i32, %c0_i32_0, %c0_i32_1 : i32, i32, i32
  }
  func.func @transform_6(%arg0: i32) -> (i32, i32, i32) {
    %c0_i32 = arith.constant 0 : i32
    %c0_i32_0 = arith.constant 0 : i32
    %c0_i32_1 = arith.constant 0 : i32
    %c0_i32_2 = arith.constant 0 : i32
    return %c0_i32, %c0_i32_0, %c0_i32_1 : i32, i32, i32
  }
  func.func @transform_7(%arg0: i32) -> (i32, i32) {
    %c0_i32 = arith.constant 0 : i32
    %c0_i32_0 = arith.constant 0 : i32
    %c0_i32_1 = arith.constant 0 : i32
    return %c0_i32, %c0_i32_0 : i32, i32
  }
  func.func @transform_8(%arg0: i32) -> (i32, i32) {
    %c0_i32 = arith.constant 0 : i32
    %c0_i32_0 = arith.constant 0 : i32
    %c0_i32_1 = arith.constant 0 : i32
    return %c0_i32, %c0_i32_0 : i32, i32
  }
  func.func @transform_9(%arg0: i32) -> (i32, i32) {
    %c0_i32 = arith.constant 0 : i32
    %c0_i32_0 = arith.constant 0 : i32
    %c0_i32_1 = arith.constant 0 : i32
    return %c0_i32, %c0_i32_0 : i32, i32
  }
}

</mosaic_0001>

<bundles_post_ra>
// kernel: reverse.2
= control target key start
LH: loop header
LB: loop body
LE: loop exit
PB: predicated region body
PF: predicated region fallthrough
CT: control target
= control target key end

     0   :  { %s4424_s0 = inlined_call_operand.vmem [shape: bf16[23,128,128], index: 0, kind: input, shape index: {}]   ;;  %s4425_s1 = inlined_call_operand.vmem [shape: bf16[23,128,128], index: 1, kind: output, shape index: {}]  }
   0x1   :  { %v2576_v0 = vld [vmem:[%s4424_s0 + $0x580] sm:$0xff]   ;;  %v2666_v23 = vld [vmem:[%s4424_s0 + $0x588] sm:$0xff]   ;;  %v2758_v46 = vld [vmem:[%s4424_s0 + $0x590] sm:$0xff]  }
   0x2   :  { %v2577_v1 = vld [vmem:[%s4424_s0 + $0x540] sm:$0xff]   ;;  %7 = vst [vmem:[%s4425_s1] sm:$0xff] %v2576_v0   ;;  %2667 = vst [vmem:[%s4425_s1 + $0x8] sm:$0xff] %v2666_v23   ;;  %v2668_v24 = vld [vmem:[%s4424_s0 + $0x548] sm:$0xff]  }
   0x3   :  { %v2579_v2 = vld [vmem:[%s4424_s0 + $0x500] sm:$0xff]   ;;  %2578 = vst [vmem:[%s4425_s1 + $0x40] sm:$0xff] %v2577_v1   ;;  %v2670_v25 = vld [vmem:[%s4424_s0 + $0x508] sm:$0xff]   ;;  %2669 = vst [vmem:[%s4425_s1 + $0x48] sm:$0xff] %v2668_v24  }
   0x4   :  { %2580 = vst [vmem:[%s4425_s1 + $0x80] sm:$0xff] %v2579_v2   ;;  %v2581_v3 = vld [vmem:[%s4424_s0 + $0x4c0] sm:$0xff]   ;;  %v2672_v26 = vld [vmem:[%s4424_s0 + $0x4c8] sm:$0xff]   ;;  %2671 = vst [vmem:[%s4425_s1 + $0x88] sm:$0xff] %v2670_v25  }
   0x5   :  { %v2583_v4 = vld [vmem:[%s4424_s0 + $0x480] sm:$0xff]   ;;  %2582 = vst [vmem:[%s4425_s1 + $0xc0] sm:$0xff] %v2581_v3   ;;  %2673 = vst [vmem:[%s4425_s1 + $0xc8] sm:$0xff] %v2672_v26   ;;  %v2674_v27 = vld [vmem:[%s4424_s0 + $0x488] sm:$0xff]  }
   0x6   :  { %v2585_v5 = vld [vmem:[%s4424_s0 + $0x440] sm:$0xff]   ;;  %2584 = vst [vmem:[%s4425_s1 + $0x100] sm:$0xff] %v2583_v4   ;;  %v2676_v28 = vld [vmem:[%s4424_s0 + $0x448] sm:$0xff]   ;;  %2675 = vst [vmem:[%s4425_s1 + $0x108] sm:$0xff] %v2674_v27  }
   0x7   :  { %2586 = vst [vmem:[%s4425_s1 + $0x140] sm:$0xff] %v2585_v5   ;;  %v2587_v6 = vld [vmem:[%s4424_s0 + $0x400] sm:$0xff]   ;;  %v2678_v29 = vld [vmem:[%s4424_s0 + $0x408] sm:$0xff]   ;;  %2677 = vst [vmem:[%s4425_s1 + $0x148] sm:$0xff] %v2676_v28  }
   0x8   :  { %v2589_v7 = vld [vmem:[%s4424_s0 + $0x3c0] sm:$0xff]   ;;  %2588 = vst [vmem:[%s4425_s1 + $0x180] sm:$0xff] %v2587_v6   ;;  %2679 = vst [vmem:[%s4425_s1 + $0x188] sm:$0xff] %v2678_v29   ;;  %v2680_v30 = vld [vmem:[%s4424_s0 + $0x3c8] sm:$0xff]  }
   0x9   :  { %v2591_v8 = vld [vmem:[%s4424_s0 + $0x380] sm:$0xff]   ;;  %2590 = vst [vmem:[%s4425_s1 + $0x1c0] sm:$0xff] %v2589_v7   ;;  %v2682_v31 = vld [vmem:[%s4424_s0 + $0x388] sm:$0xff]   ;;  %2681 = vst [vmem:[%s4425_s1 + $0x1c8] sm:$0xff] %v2680_v30  }
   0xa   :  { %2592 = vst [vmem:[%s4425_s1 + $0x200] sm:$0xff] %v2591_v8   ;;  %v2593_v9 = vld [vmem:[%s4424_s0 + $0x340] sm:$0xff]   ;;  %v2684_v32 = vld [vmem:[%s4424_s0 + $0x348] sm:$0xff]   ;;  %2683 = vst [vmem:[%s4425_s1 + $0x208] sm:$0xff] %v2682_v31  }
   0xb   :  { %v2595_v10 = vld [vmem:[%s4424_s0 + $0x300] sm:$0xff]   ;;  %2594 = vst [vmem:[%s4425_s1 + $0x240] sm:$0xff] %v2593_v9   ;;  %2685 = vst [vmem:[%s4425_s1 + $0x248] sm:$0xff] %v2684_v32   ;;  %v2686_v33 = vld [vmem:[%s4424_s0 + $0x308] sm:$0xff]  }
   0xc   :  { %v2597_v11 = vld [vmem:[%s4424_s0 + $0x2c0] sm:$0xff]   ;;  %2596 = vst [vmem:[%s4425_s1 + $0x280] sm:$0xff] %v2595_v10   ;;  %v2688_v34 = vld [vmem:[%s4424_s0 + $0x2c8] sm:$0xff]   ;;  %2687 = vst [vmem:[%s4425_s1 + $0x288] sm:$0xff] %v2686_v33  }
   0xd   :  { %2598 = vst [vmem:[%s4425_s1 + $0x2c0] sm:$0xff] %v2597_v11   ;;  %v2599_v12 = vld [vmem:[%s4424_s0 + $0x280] sm:$0xff]   ;;  %v2690_v35 = vld [vmem:[%s4424_s0 + $0x288] sm:$0xff]   ;;  %2689 = vst [vmem:[%s4425_s1 + $0x2c8] sm:$0xff] %v2688_v34  }
   0xe   :  { %v2601_v13 = vld [vmem:[%s4424_s0 + $0x240] sm:$0xff]   ;;  %2600 = vst [vmem:[%s4425_s1 + $0x300] sm:$0xff] %v2599_v12   ;;  %2691 = vst [vmem:[%s4425_s1 + $0x308] sm:$0xff] %v2690_v35   ;;  %v2692_v36 = vld [vmem:[%s4424_s0 + $0x248] sm:$0xff]  }
   0xf   :  { %v2603_v14 = vld [vmem:[%s4424_s0 + $0x200] sm:$0xff]   ;;  %2602 = vst [vmem:[%s4425_s1 + $0x340] sm:$0xff] %v2601_v13   ;;  %v2694_v37 = vld [vmem:[%s4424_s0 + $0x208] sm:$0xff]   ;;  %2693 = vst [vmem:[%s4425_s1 + $0x348] sm:$0xff] %v2692_v36  }
  0x10   :  { %2604 = vst [vmem:[%s4425_s1 + $0x380] sm:$0xff] %v2603_v14   ;;  %v2605_v15 = vld [vmem:[%s4424_s0 + $0x1c0] sm:$0xff]   ;;  %v2696_v38 = vld [vmem:[%s4424_s0 + $0x1c8] sm:$0xff]   ;;  %2695 = vst [vmem:[%s4425_s1 + $0x388] sm:$0xff] %v2694_v37  }
  0x11   :  { %v2607_v16 = vld [vmem:[%s4424_s0 + $0x180] sm:$0xff]   ;;  %2606 = vst [vmem:[%s4425_s1 + $0x3c0] sm:$0xff] %v2605_v15   ;;  %2697 = vst [vmem:[%s4425_s1 + $0x3c8] sm:$0xff] %v2696_v38   ;;  %v2698_v39 = vld [vmem:[%s4424_s0 + $0x188] sm:$0xff]  }
  0x12   :  { %v2609_v17 = vld [vmem:[%s4424_s0 + $0x140] sm:$0xff]   ;;  %2608 = vst [vmem:[%s4425_s1 + $0x400] sm:$0xff] %v2607_v16   ;;  %v2700_v40 = vld [vmem:[%s4424_s0 + $0x148] sm:$0xff]   ;;  %2699 = vst [vmem:[%s4425_s1 + $0x408] sm:$0xff] %v2698_v39  }
  0x13   :  { %2610 = vst [vmem:[%s4425_s1 + $0x440] sm:$0xff] %v2609_v17   ;;  %v2611_v18 = vld [vmem:[%s4424_s0 + $0x100] sm:$0xff]   ;;  %v2702_v41 = vld [vmem:[%s4424_s0 + $0x108] sm:$0xff]   ;;  %2701 = vst [vmem:[%s4425_s1 + $0x448] sm:$0xff] %v2700_v40  }
  0x14   :  { %v2613_v19 = vld [vmem:[%s4424_s0 + $0xc0] sm:$0xff]   ;;  %2612 = vst [vmem:[%s4425_s1 + $0x480] sm:$0xff] %v2611_v18   ;;  %2703 = vst [vmem:[%s4425_s1 + $0x488] sm:$0xff] %v2702_v41   ;;  %v2704_v42 = vld [vmem:[%s4424_s0 + $0xc8] sm:$0xff]  }
  0x15   :  { %v2615_v20 = vld [vmem:[%s4424_s0 + $0x80] sm:$0xff]   ;;  %2614 = vst [vmem:[%s4425_s1 + $0x4c0] sm:$0xff] %v2613_v19   ;;  %v2706_v43 = vld [vmem:[%s4424_s0 + $0x88] sm:$0xff]   ;;  %2705 = vst [vmem:[%s4425_s1 + $0x4c8] sm:$0xff] %v2704_v42  }
  0x16   :  { %2616 = vst [vmem:[%s4425_s1 + $0x500] sm:$0xff] %v2615_v20   ;;  %v2617_v21 = vld [vmem:[%s4424_s0 + $0x40] sm:$0xff]   ;;  %v2708_v44 = vld [vmem:[%s4424_s0 + $0x48] sm:$0xff]   ;;  %2707 = vst [vmem:[%s4425_s1 + $0x508] sm:$0xff] %v2706_v43  }
  0x17   :  { %v155_v22 = vld [vmem:[%s4424_s0] sm:$0xff]   ;;  %2618 = vst [vmem:[%s4425_s1 + $0x540] sm:$0xff] %v2617_v21   ;;  %2709 = vst [vmem:[%s4425_s1 + $0x548] sm:$0xff] %v2708_v44   ;;  %v2710_v45 = vld [vmem:[%s4424_s0 + $0x8] sm:$0xff]  }
  0x18   :  { %2619 = vst [vmem:[%s4425_s1 + $0x580] sm:$0xff] %v155_v22   ;;  %v2760_v47 = vld [vmem:[%s4424_s0 + $0x550] sm:$0xff]   ;;  %2711 = vst [vmem:[%s4425_s1 + $0x588] sm:$0xff] %v2710_v45   ;;  %v2850_v5 = vld [vmem:[%s4424_s0 + $0x598] sm:$0xff]  }
  0x19   :  { %2759 = vst [vmem:[%s4425_s1 + $0x10] sm:$0xff] %v2758_v46   ;;  %2761 = vst [vmem:[%s4425_s1 + $0x50] sm:$0xff] %v2760_v47   ;;  %v2762_v48 = vld [vmem:[%s4424_s0 + $0x510] sm:$0xff]   ;;  %v2852_v6 = vld [vmem:[%s4424_s0 + $0x558] sm:$0xff]  }
  0x1a   :  { %v2764_v49 = vld [vmem:[%s4424_s0 + $0x4d0] sm:$0xff]   ;;  %2763 = vst [vmem:[%s4425_s1 + $0x90] sm:$0xff] %v2762_v48   ;;  %v2854_v7 = vld [vmem:[%s4424_s0 + $0x518] sm:$0xff]   ;;  %2851 = vst [vmem:[%s4425_s1 + $0x18] sm:$0xff] %v2850_v5  }
  0x1b   :  { %v2766_v50 = vld [vmem:[%s4424_s0 + $0x490] sm:$0xff]   ;;  %2765 = vst [vmem:[%s4425_s1 + $0xd0] sm:$0xff] %v2764_v49   ;;  %2853 = vst [vmem:[%s4425_s1 + $0x58] sm:$0xff] %v2852_v6   ;;  %v2856_v8 = vld [vmem:[%s4424_s0 + $0x4d8] sm:$0xff]  }
  0x1c   :  { %2767 = vst [vmem:[%s4425_s1 + $0x110] sm:$0xff] %v2766_v50   ;;  %v2768_v51 = vld [vmem:[%s4424_s0 + $0x450] sm:$0xff]   ;;  %2855 = vst [vmem:[%s4425_s1 + $0x98] sm:$0xff] %v2854_v7   ;;  %v2858_v9 = vld [vmem:[%s4424_s0 + $0x498] sm:$0xff]  }
  0x1d   :  { %v2770_v52 = vld [vmem:[%s4424_s0 + $0x410] sm:$0xff]   ;;  %2769 = vst [vmem:[%s4425_s1 + $0x150] sm:$0xff] %v2768_v51   ;;  %v2860_v10 = vld [vmem:[%s4424_s0 + $0x458] sm:$0xff]   ;;  %2857 = vst [vmem:[%s4425_s1 + $0xd8] sm:$0xff] %v2856_v8  }
  0x1e   :  { %v2772_v53 = vld [vmem:[%s4424_s0 + $0x3d0] sm:$0xff]   ;;  %2771 = vst [vmem:[%s4425_s1 + $0x190] sm:$0xff] %v2770_v52   ;;  %2859 = vst [vmem:[%s4425_s1 + $0x118] sm:$0xff] %v2858_v9   ;;  %v2862_v11 = vld [vmem:[%s4424_s0 + $0x418] sm:$0xff]  }
  0x1f   :  { %2773 = vst [vmem:[%s4425_s1 + $0x1d0] sm:$0xff] %v2772_v53   ;;  %v2774_v54 = vld [vmem:[%s4424_s0 + $0x390] sm:$0xff]   ;;  %2861 = vst [vmem:[%s4425_s1 + $0x158] sm:$0xff] %v2860_v10   ;;  %v2864_v12 = vld [vmem:[%s4424_s0 + $0x3d8] sm:$0xff]  }
  0x20   :  { %v2776_v55 = vld [vmem:[%s4424_s0 + $0x350] sm:$0xff]   ;;  %2775 = vst [vmem:[%s4425_s1 + $0x210] sm:$0xff] %v2774_v54   ;;  %v2866_v13 = vld [vmem:[%s4424_s0 + $0x398] sm:$0xff]   ;;  %2863 = vst [vmem:[%s4425_s1 + $0x198] sm:$0xff] %v2862_v11  }
  0x21   :  { %v2778_v56 = vld [vmem:[%s4424_s0 + $0x310] sm:$0xff]   ;;  %2777 = vst [vmem:[%s4425_s1 + $0x250] sm:$0xff] %v2776_v55   ;;  %2865 = vst [vmem:[%s4425_s1 + $0x1d8] sm:$0xff] %v2864_v12   ;;  %v2868_v14 = vld [vmem:[%s4424_s0 + $0x358] sm:$0xff]  }
  0x22   :  { %2779 = vst [vmem:[%s4425_s1 + $0x290] sm:$0xff] %v2778_v56   ;;  %v2780_v57 = vld [vmem:[%s4424_s0 + $0x2d0] sm:$0xff]   ;;  %2867 = vst [vmem:[%s4425_s1 + $0x218] sm:$0xff] %v2866_v13   ;;  %v2870_v15 = vld [vmem:[%s4424_s0 + $0x318] sm:$0xff]  }
  0x23   :  { %v2782_v58 = vld [vmem:[%s4424_s0 + $0x290] sm:$0xff]   ;;  %2781 = vst [vmem:[%s4425_s1 + $0x2d0] sm:$0xff] %v2780_v57   ;;  %v2872_v16 = vld [vmem:[%s4424_s0 + $0x2d8] sm:$0xff]   ;;  %2869 = vst [vmem:[%s4425_s1 + $0x258] sm:$0xff] %v2868_v14  }
  0x24   :  { %v2784_v59 = vld [vmem:[%s4424_s0 + $0x250] sm:$0xff]   ;;  %2783 = vst [vmem:[%s4425_s1 + $0x310] sm:$0xff] %v2782_v58   ;;  %2871 = vst [vmem:[%s4425_s1 + $0x298] sm:$0xff] %v2870_v15   ;;  %v2874_v17 = vld [vmem:[%s4424_s0 + $0x298] sm:$0xff]  }
  0x25   :  { %2785 = vst [vmem:[%s4425_s1 + $0x350] sm:$0xff] %v2784_v59   ;;  %v2786_v60 = vld [vmem:[%s4424_s0 + $0x210] sm:$0xff]   ;;  %2873 = vst [vmem:[%s4425_s1 + $0x2d8] sm:$0xff] %v2872_v16   ;;  %v2876_v18 = vld [vmem:[%s4424_s0 + $0x258] sm:$0xff]  }
  0x26   :  { %v2788_v61 = vld [vmem:[%s4424_s0 + $0x1d0] sm:$0xff]   ;;  %2787 = vst [vmem:[%s4425_s1 + $0x390] sm:$0xff] %v2786_v60   ;;  %v2878_v19 = vld [vmem:[%s4424_s0 + $0x218] sm:$0xff]   ;;  %2875 = vst [vmem:[%s4425_s1 + $0x318] sm:$0xff] %v2874_v17  }
  0x27   :  { %v2790_v62 = vld [vmem:[%s4424_s0 + $0x190] sm:$0xff]   ;;  %2789 = vst [vmem:[%s4425_s1 + $0x3d0] sm:$0xff] %v2788_v61   ;;  %2877 = vst [vmem:[%s4425_s1 + $0x358] sm:$0xff] %v2876_v18   ;;  %v2880_v20 = vld [vmem:[%s4424_s0 + $0x1d8] sm:$0xff]  }
  0x28   :  { %2791 = vst [vmem:[%s4425_s1 + $0x410] sm:$0xff] %v2790_v62   ;;  %v2792_v63 = vld [vmem:[%s4424_s0 + $0x150] sm:$0xff]   ;;  %2879 = vst [vmem:[%s4425_s1 + $0x398] sm:$0xff] %v2878_v19   ;;  %v2882_v21 = vld [vmem:[%s4424_s0 + $0x198] sm:$0xff]  }
  0x29   :  { %v2794_v0 = vld [vmem:[%s4424_s0 + $0x110] sm:$0xff]   ;;  %2793 = vst [vmem:[%s4425_s1 + $0x450] sm:$0xff] %v2792_v63   ;;  %v2884_v22 = vld [vmem:[%s4424_s0 + $0x158] sm:$0xff]   ;;  %2881 = vst [vmem:[%s4425_s1 + $0x3d8] sm:$0xff] %v2880_v20  }
  0x2a   :  { %v2796_v1 = vld [vmem:[%s4424_s0 + $0xd0] sm:$0xff]   ;;  %2795 = vst [vmem:[%s4425_s1 + $0x490] sm:$0xff] %v2794_v0   ;;  %2883 = vst [vmem:[%s4425_s1 + $0x418] sm:$0xff] %v2882_v21   ;;  %v2886_v23 = vld [vmem:[%s4424_s0 + $0x118] sm:$0xff]  }
  0x2b   :  { %2797 = vst [vmem:[%s4425_s1 + $0x4d0] sm:$0xff] %v2796_v1   ;;  %v2798_v2 = vld [vmem:[%s4424_s0 + $0x90] sm:$0xff]   ;;  %2885 = vst [vmem:[%s4425_s1 + $0x458] sm:$0xff] %v2884_v22   ;;  %v2888_v24 = vld [vmem:[%s4424_s0 + $0xd8] sm:$0xff]  }
  0x2c   :  { %v2800_v3 = vld [vmem:[%s4424_s0 + $0x50] sm:$0xff]   ;;  %2799 = vst [vmem:[%s4425_s1 + $0x510] sm:$0xff] %v2798_v2   ;;  %v2890_v25 = vld [vmem:[%s4424_s0 + $0x98] sm:$0xff]   ;;  %2887 = vst [vmem:[%s4425_s1 + $0x498] sm:$0xff] %v2886_v23  }
  0x2d   :  { %v2802_v4 = vld [vmem:[%s4424_s0 + $0x10] sm:$0xff]   ;;  %2801 = vst [vmem:[%s4425_s1 + $0x550] sm:$0xff] %v2800_v3   ;;  %2889 = vst [vmem:[%s4425_s1 + $0x4d8] sm:$0xff] %v2888_v24   ;;  %v2892_v26 = vld [vmem:[%s4424_s0 + $0x58] sm:$0xff]  }
  0x2e   :  { %2803 = vst [vmem:[%s4425_s1 + $0x590] sm:$0xff] %v2802_v4   ;;  %2891 = vst [vmem:[%s4425_s1 + $0x518] sm:$0xff] %v2890_v25   ;;  %v2894_v27 = vld [vmem:[%s4424_s0 + $0x18] sm:$0xff]   ;;  %v2942_v28 = vld [vmem:[%s4424_s0 + $0x5a0] sm:$0xff]  }
  0x2f   :  { %2893 = vst [vmem:[%s4425_s1 + $0x558] sm:$0xff] %v2892_v26   ;;  %2895 = vst [vmem:[%s4425_s1 + $0x598] sm:$0xff] %v2894_v27   ;;  %v2944_v29 = vld [vmem:[%s4424_s0 + $0x560] sm:$0xff]   ;;  %v3034_v51 = vld [vmem:[%s4424_s0 + $0x5a8] sm:$0xff]  }
  0x30   :  { %2943 = vst [vmem:[%s4425_s1 + $0x20] sm:$0xff] %v2942_v28   ;;  %v2946_v30 = vld [vmem:[%s4424_s0 + $0x520] sm:$0xff]   ;;  %2945 = vst [vmem:[%s4425_s1 + $0x60] sm:$0xff] %v2944_v29   ;;  %v3036_v52 = vld [vmem:[%s4424_s0 + $0x568] sm:$0xff]  }
  0x31   :  { %v2948_v31 = vld [vmem:[%s4424_s0 + $0x4e0] sm:$0xff]   ;;  %2947 = vst [vmem:[%s4425_s1 + $0xa0] sm:$0xff] %v2946_v30   ;;  %3035 = vst [vmem:[%s4425_s1 + $0x28] sm:$0xff] %v3034_v51   ;;  %v3038_v53 = vld [vmem:[%s4424_s0 + $0x528] sm:$0xff]  }
  0x32   :  { %2949 = vst [vmem:[%s4425_s1 + $0xe0] sm:$0xff] %v2948_v31   ;;  %v2950_v32 = vld [vmem:[%s4424_s0 + $0x4a0] sm:$0xff]   ;;  %3037 = vst [vmem:[%s4425_s1 + $0x68] sm:$0xff] %v3036_v52   ;;  %v3040_v54 = vld [vmem:[%s4424_s0 + $0x4e8] sm:$0xff]  }
  0x33   :  { %v2952_v33 = vld [vmem:[%s4424_s0 + $0x460] sm:$0xff]   ;;  %2951 = vst [vmem:[%s4425_s1 + $0x120] sm:$0xff] %v2950_v32   ;;  %v3042_v55 = vld [vmem:[%s4424_s0 + $0x4a8] sm:$0xff]   ;;  %3039 = vst [vmem:[%s4425_s1 + $0xa8] sm:$0xff] %v3038_v53  }
  0x34   :  { %v2954_v34 = vld [vmem:[%s4424_s0 + $0x420] sm:$0xff]   ;;  %2953 = vst [vmem:[%s4425_s1 + $0x160] sm:$0xff] %v2952_v33   ;;  %3041 = vst [vmem:[%s4425_s1 + $0xe8] sm:$0xff] %v3040_v54   ;;  %v3044_v56 = vld [vmem:[%s4424_s0 + $0x468] sm:$0xff]  }
  0x35   :  { %2955 = vst [vmem:[%s4425_s1 + $0x1a0] sm:$0xff] %v2954_v34   ;;  %v2956_v35 = vld [vmem:[%s4424_s0 + $0x3e0] sm:$0xff]   ;;  %3043 = vst [vmem:[%s4425_s1 + $0x128] sm:$0xff] %v3042_v55   ;;  %v3046_v57 = vld [vmem:[%s4424_s0 + $0x428] sm:$0xff]  }
  0x36   :  { %v2958_v36 = vld [vmem:[%s4424_s0 + $0x3a0] sm:$0xff]   ;;  %2957 = vst [vmem:[%s4425_s1 + $0x1e0] sm:$0xff] %v2956_v35   ;;  %v3048_v58 = vld [vmem:[%s4424_s0 + $0x3e8] sm:$0xff]   ;;  %3045 = vst [vmem:[%s4425_s1 + $0x168] sm:$0xff] %v3044_v56  }
  0x37   :  { %v2960_v37 = vld [vmem:[%s4424_s0 + $0x360] sm:$0xff]   ;;  %2959 = vst [vmem:[%s4425_s1 + $0x220] sm:$0xff] %v2958_v36   ;;  %3047 = vst [vmem:[%s4425_s1 + $0x1a8] sm:$0xff] %v3046_v57   ;;  %v3050_v59 = vld [vmem:[%s4424_s0 + $0x3a8] sm:$0xff]  }
  0x38   :  { %2961 = vst [vmem:[%s4425_s1 + $0x260] sm:$0xff] %v2960_v37   ;;  %v2962_v38 = vld [vmem:[%s4424_s0 + $0x320] sm:$0xff]   ;;  %3049 = vst [vmem:[%s4425_s1 + $0x1e8] sm:$0xff] %v3048_v58   ;;  %v3052_v60 = vld [vmem:[%s4424_s0 + $0x368] sm:$0xff]  }
  0x39   :  { %v2964_v39 = vld [vmem:[%s4424_s0 + $0x2e0] sm:$0xff]   ;;  %2963 = vst [vmem:[%s4425_s1 + $0x2a0] sm:$0xff] %v2962_v38   ;;  %v3054_v61 = vld [vmem:[%s4424_s0 + $0x328] sm:$0xff]   ;;  %3051 = vst [vmem:[%s4425_s1 + $0x228] sm:$0xff] %v3050_v59  }
  0x3a   :  { %v2966_v40 = vld [vmem:[%s4424_s0 + $0x2a0] sm:$0xff]   ;;  %2965 = vst [vmem:[%s4425_s1 + $0x2e0] sm:$0xff] %v2964_v39   ;;  %3053 = vst [vmem:[%s4425_s1 + $0x268] sm:$0xff] %v3052_v60   ;;  %v3056_v62 = vld [vmem:[%s4424_s0 + $0x2e8] sm:$0xff]  }
  0x3b   :  { %2967 = vst [vmem:[%s4425_s1 + $0x320] sm:$0xff] %v2966_v40   ;;  %v2968_v41 = vld [vmem:[%s4424_s0 + $0x260] sm:$0xff]   ;;  %3055 = vst [vmem:[%s4425_s1 + $0x2a8] sm:$0xff] %v3054_v61   ;;  %v3058_v63 = vld [vmem:[%s4424_s0 + $0x2a8] sm:$0xff]  }
  0x3c   :  { %v2970_v42 = vld [vmem:[%s4424_s0 + $0x220] sm:$0xff]   ;;  %2969 = vst [vmem:[%s4425_s1 + $0x360] sm:$0xff] %v2968_v41   ;;  %v3060_v0 = vld [vmem:[%s4424_s0 + $0x268] sm:$0xff]   ;;  %3057 = vst [vmem:[%s4425_s1 + $0x2e8] sm:$0xff] %v3056_v62  }
  0x3d   :  { %v2972_v43 = vld [vmem:[%s4424_s0 + $0x1e0] sm:$0xff]   ;;  %2971 = vst [vmem:[%s4425_s1 + $0x3a0] sm:$0xff] %v2970_v42   ;;  %3059 = vst [vmem:[%s4425_s1 + $0x328] sm:$0xff] %v3058_v63   ;;  %v3062_v1 = vld [vmem:[%s4424_s0 + $0x228] sm:$0xff]  }
  0x3e   :  { %2973 = vst [vmem:[%s4425_s1 + $0x3e0] sm:$0xff] %v2972_v43   ;;  %v2974_v44 = vld [vmem:[%s4424_s0 + $0x1a0] sm:$0xff]   ;;  %3061 = vst [vmem:[%s4425_s1 + $0x368] sm:$0xff] %v3060_v0   ;;  %v3064_v2 = vld [vmem:[%s4424_s0 + $0x1e8] sm:$0xff]  }
  0x3f   :  { %v2976_v45 = vld [vmem:[%s4424_s0 + $0x160] sm:$0xff]   ;;  %2975 = vst [vmem:[%s4425_s1 + $0x420] sm:$0xff] %v2974_v44   ;;  %v3066_v3 = vld [vmem:[%s4424_s0 + $0x1a8] sm:$0xff]   ;;  %3063 = vst [vmem:[%s4425_s1 + $0x3a8] sm:$0xff] %v3062_v1  }
  0x40   :  { %v2978_v46 = vld [vmem:[%s4424_s0 + $0x120] sm:$0xff]   ;;  %2977 = vst [vmem:[%s4425_s1 + $0x460] sm:$0xff] %v2976_v45   ;;  %3065 = vst [vmem:[%s4425_s1 + $0x3e8] sm:$0xff] %v3064_v2   ;;  %v3068_v4 = vld [vmem:[%s4424_s0 + $0x168] sm:$0xff]  }
  0x41   :  { %2979 = vst [vmem:[%s4425_s1 + $0x4a0] sm:$0xff] %v2978_v46   ;;  %v2980_v47 = vld [vmem:[%s4424_s0 + $0xe0] sm:$0xff]   ;;  %3067 = vst [vmem:[%s4425_s1 + $0x428] sm:$0xff] %v3066_v3   ;;  %v3070_v5 = vld [vmem:[%s4424_s0 + $0x128] sm:$0xff]  }
  0x42   :  { %v2982_v48 = vld [vmem:[%s4424_s0 + $0xa0] sm:$0xff]   ;;  %2981 = vst [vmem:[%s4425_s1 + $0x4e0] sm:$0xff] %v2980_v47   ;;  %v3072_v6 = vld [vmem:[%s4424_s0 + $0xe8] sm:$0xff]   ;;  %3069 = vst [vmem:[%s4425_s1 + $0x468] sm:$0xff] %v3068_v4  }
  0x43   :  { %v2984_v49 = vld [vmem:[%s4424_s0 + $0x60] sm:$0xff]   ;;  %2983 = vst [vmem:[%s4425_s1 + $0x520] sm:$0xff] %v2982_v48   ;;  %3071 = vst [vmem:[%s4425_s1 + $0x4a8] sm:$0xff] %v3070_v5   ;;  %v3074_v7 = vld [vmem:[%s4424_s0 + $0xa8] sm:$0xff]  }
  0x44   :  { %2985 = vst [vmem:[%s4425_s1 + $0x560] sm:$0xff] %v2984_v49   ;;  %v2986_v50 = vld [vmem:[%s4424_s0 + $0x20] sm:$0xff]   ;;  %3073 = vst [vmem:[%s4425_s1 + $0x4e8] sm:$0xff] %v3072_v6   ;;  %v3076_v8 = vld [vmem:[%s4424_s0 + $0x68] sm:$0xff]  }
  0x45   :  { %2987 = vst [vmem:[%s4425_s1 + $0x5a0] sm:$0xff] %v2986_v50   ;;  %v3078_v9 = vld [vmem:[%s4424_s0 + $0x28] sm:$0xff]   ;;  %3075 = vst [vmem:[%s4425_s1 + $0x528] sm:$0xff] %v3074_v7   ;;  %v3126_v10 = vld [vmem:[%s4424_s0 + $0x5b0] sm:$0xff]  }
  0x46   :  { %3077 = vst [vmem:[%s4425_s1 + $0x568] sm:$0xff] %v3076_v8   ;;  %3079 = vst [vmem:[%s4425_s1 + $0x5a8] sm:$0xff] %v3078_v9   ;;  %v3128_v11 = vld [vmem:[%s4424_s0 + $0x570] sm:$0xff]   ;;  %v3218_v33 = vld [vmem:[%s4424_s0 + $0x5b8] sm:$0xff]  }
  0x47   :  { %v3130_v12 = vld [vmem:[%s4424_s0 + $0x530] sm:$0xff]   ;;  %3127 = vst [vmem:[%s4425_s1 + $0x30] sm:$0xff] %v3126_v10   ;;  %3129 = vst [vmem:[%s4425_s1 + $0x70] sm:$0xff] %v3128_v11   ;;  %v3220_v34 = vld [vmem:[%s4424_s0 + $0x578] sm:$0xff]  }
  0x48   :  { %3131 = vst [vmem:[%s4425_s1 + $0xb0] sm:$0xff] %v3130_v12   ;;  %v3132_v13 = vld [vmem:[%s4424_s0 + $0x4f0] sm:$0xff]   ;;  %3219 = vst [vmem:[%s4425_s1 + $0x38] sm:$0xff] %v3218_v33   ;;  %v3222_v35 = vld [vmem:[%s4424_s0 + $0x538] sm:$0xff]  }
  0x49   :  { %v3134_v14 = vld [vmem:[%s4424_s0 + $0x4b0] sm:$0xff]   ;;  %3133 = vst [vmem:[%s4425_s1 + $0xf0] sm:$0xff] %v3132_v13   ;;  %v3224_v36 = vld [vmem:[%s4424_s0 + $0x4f8] sm:$0xff]   ;;  %3221 = vst [vmem:[%s4425_s1 + $0x78] sm:$0xff] %v3220_v34  }
  0x4a   :  { %v3136_v15 = vld [vmem:[%s4424_s0 + $0x470] sm:$0xff]   ;;  %3135 = vst [vmem:[%s4425_s1 + $0x130] sm:$0xff] %v3134_v14   ;;  %3223 = vst [vmem:[%s4425_s1 + $0xb8] sm:$0xff] %v3222_v35   ;;  %v3226_v37 = vld [vmem:[%s4424_s0 + $0x4b8] sm:$0xff]  }
  0x4b   :  { %3137 = vst [vmem:[%s4425_s1 + $0x170] sm:$0xff] %v3136_v15   ;;  %v3138_v16 = vld [vmem:[%s4424_s0 + $0x430] sm:$0xff]   ;;  %3225 = vst [vmem:[%s4425_s1 + $0xf8] sm:$0xff] %v3224_v36   ;;  %v3228_v38 = vld [vmem:[%s4424_s0 + $0x478] sm:$0xff]  }
  0x4c   :  { %v3140_v17 = vld [vmem:[%s4424_s0 + $0x3f0] sm:$0xff]   ;;  %3139 = vst [vmem:[%s4425_s1 + $0x1b0] sm:$0xff] %v3138_v16   ;;  %v3230_v39 = vld [vmem:[%s4424_s0 + $0x438] sm:$0xff]   ;;  %3227 = vst [vmem:[%s4425_s1 + $0x138] sm:$0xff] %v3226_v37  }
  0x4d   :  { %v3142_v18 = vld [vmem:[%s4424_s0 + $0x3b0] sm:$0xff]   ;;  %3141 = vst [vmem:[%s4425_s1 + $0x1f0] sm:$0xff] %v3140_v17   ;;  %3229 = vst [vmem:[%s4425_s1 + $0x178] sm:$0xff] %v3228_v38   ;;  %v3232_v40 = vld [vmem:[%s4424_s0 + $0x3f8] sm:$0xff]  }
  0x4e   :  { %3143 = vst [vmem:[%s4425_s1 + $0x230] sm:$0xff] %v3142_v18   ;;  %v3144_v19 = vld [vmem:[%s4424_s0 + $0x370] sm:$0xff]   ;;  %3231 = vst [vmem:[%s4425_s1 + $0x1b8] sm:$0xff] %v3230_v39   ;;  %v3234_v41 = vld [vmem:[%s4424_s0 + $0x3b8] sm:$0xff]  }
  0x4f   :  { %v3146_v20 = vld [vmem:[%s4424_s0 + $0x330] sm:$0xff]   ;;  %3145 = vst [vmem:[%s4425_s1 + $0x270] sm:$0xff] %v3144_v19   ;;  %v3236_v42 = vld [vmem:[%s4424_s0 + $0x378] sm:$0xff]   ;;  %3233 = vst [vmem:[%s4425_s1 + $0x1f8] sm:$0xff] %v3232_v40  }
  0x50   :  { %v3148_v21 = vld [vmem:[%s4424_s0 + $0x2f0] sm:$0xff]   ;;  %3147 = vst [vmem:[%s4425_s1 + $0x2b0] sm:$0xff] %v3146_v20   ;;  %3235 = vst [vmem:[%s4425_s1 + $0x238] sm:$0xff] %v3234_v41   ;;  %v3238_v43 = vld [vmem:[%s4424_s0 + $0x338] sm:$0xff]  }
  0x51   :  { %3149 = vst [vmem:[%s4425_s1 + $0x2f0] sm:$0xff] %v3148_v21   ;;  %v3150_v22 = vld [vmem:[%s4424_s0 + $0x2b0] sm:$0xff]   ;;  %3237 = vst [vmem:[%s4425_s1 + $0x278] sm:$0xff] %v3236_v42   ;;  %v3240_v44 = vld [vmem:[%s4424_s0 + $0x2f8] sm:$0xff]  }
  0x52   :  { %v3152_v23 = vld [vmem:[%s4424_s0 + $0x270] sm:$0xff]   ;;  %3151 = vst [vmem:[%s4425_s1 + $0x330] sm:$0xff] %v3150_v22   ;;  %v3242_v45 = vld [vmem:[%s4424_s0 + $0x2b8] sm:$0xff]   ;;  %3239 = vst [vmem:[%s4425_s1 + $0x2b8] sm:$0xff] %v3238_v43  }
  0x53   :  { %v3154_v24 = vld [vmem:[%s4424_s0 + $0x230] sm:$0xff]   ;;  %3153 = vst [vmem:[%s4425_s1 + $0x370] sm:$0xff] %v3152_v23   ;;  %3241 = vst [vmem:[%s4425_s1 + $0x2f8] sm:$0xff] %v3240_v44   ;;  %v3244_v46 = vld [vmem:[%s4424_s0 + $0x278] sm:$0xff]  }
  0x54   :  { %3155 = vst [vmem:[%s4425_s1 + $0x3b0] sm:$0xff] %v3154_v24   ;;  %v3156_v25 = vld [vmem:[%s4424_s0 + $0x1f0] sm:$0xff]   ;;  %3243 = vst [vmem:[%s4425_s1 + $0x338] sm:$0xff] %v3242_v45   ;;  %v3246_v47 = vld [vmem:[%s4424_s0 + $0x238] sm:$0xff]  }
  0x55   :  { %v3158_v26 = vld [vmem:[%s4424_s0 + $0x1b0] sm:$0xff]   ;;  %3157 = vst [vmem:[%s4425_s1 + $0x3f0] sm:$0xff] %v3156_v25   ;;  %v3248_v48 = vld [vmem:[%s4424_s0 + $0x1f8] sm:$0xff]   ;;  %3245 = vst [vmem:[%s4425_s1 + $0x378] sm:$0xff] %v3244_v46  }
  0x56   :  { %v3160_v27 = vld [vmem:[%s4424_s0 + $0x170] sm:$0xff]   ;;  %3159 = vst [vmem:[%s4425_s1 + $0x430] sm:$0xff] %v3158_v26   ;;  %3247 = vst [vmem:[%s4425_s1 + $0x3b8] sm:$0xff] %v3246_v47   ;;  %v3250_v49 = vld [vmem:[%s4424_s0 + $0x1b8] sm:$0xff]  }
  0x57   :  { %3161 = vst [vmem:[%s4425_s1 + $0x470] sm:$0xff] %v3160_v27   ;;  %v3162_v28 = vld [vmem:[%s4424_s0 + $0x130] sm:$0xff]   ;;  %3249 = vst [vmem:[%s4425_s1 + $0x3f8] sm:$0xff] %v3248_v48   ;;  %v3252_v50 = vld [vmem:[%s4424_s0 + $0x178] sm:$0xff]  }
  0x58   :  { %v3164_v29 = vld [vmem:[%s4424_s0 + $0xf0] sm:$0xff]   ;;  %3163 = vst [vmem:[%s4425_s1 + $0x4b0] sm:$0xff] %v3162_v28   ;;  %v3254_v51 = vld [vmem:[%s4424_s0 + $0x138] sm:$0xff]   ;;  %3251 = vst [vmem:[%s4425_s1 + $0x438] sm:$0xff] %v3250_v49  }
  0x59   :  { %v3166_v30 = vld [vmem:[%s4424_s0 + $0xb0] sm:$0xff]   ;;  %3165 = vst [vmem:[%s4425_s1 + $0x4f0] sm:$0xff] %v3164_v29   ;;  %3253 = vst [vmem:[%s4425_s1 + $0x478] sm:$0xff] %v3252_v50   ;;  %v3256_v52 = vld [vmem:[%s4424_s0 + $0xf8] sm:$0xff]  }
  0x5a   :  { %3167 = vst [vmem:[%s4425_s1 + $0x530] sm:$0xff] %v3166_v30   ;;  %v3168_v31 = vld [vmem:[%s4424_s0 + $0x70] sm:$0xff]   ;;  %3255 = vst [vmem:[%s4425_s1 + $0x4b8] sm:$0xff] %v3254_v51   ;;  %v3258_v53 = vld [vmem:[%s4424_s0 + $0xb8] sm:$0xff]  }
  0x5b   :  { %v3170_v32 = vld [vmem:[%s4424_s0 + $0x30] sm:$0xff]   ;;  %3169 = vst [vmem:[%s4425_s1 + $0x570] sm:$0xff] %v3168_v31   ;;  %v3260_v54 = vld [vmem:[%s4424_s0 + $0x78] sm:$0xff]   ;;  %3257 = vst [vmem:[%s4425_s1 + $0x4f8] sm:$0xff] %v3256_v52  }
  0x5c   :  { %3171 = vst [vmem:[%s4425_s1 + $0x5b0] sm:$0xff] %v3170_v32   ;;  %3259 = vst [vmem:[%s4425_s1 + $0x538] sm:$0xff] %v3258_v53   ;;  %v3262_v55 = vld [vmem:[%s4424_s0 + $0x38] sm:$0xff]  }
  0x5d   :  { %3261 = vst [vmem:[%s4425_s1 + $0x578] sm:$0xff] %v3260_v54   ;;  %3263 = vst [vmem:[%s4425_s1 + $0x5b8] sm:$0xff] %v3262_v55  }

// kernel: resgcn25_forward.1
= control target key start
LH: loop header
LB: loop body
LE: loop exit
PB: predicated region body
PF: predicated region fallthrough
CT: control target
= control target key end

     0   :  { %v2436_v1 = vmov 0   ;;  %vm153_vm0 = vcmask 523264   ;;  %s3350_s2 = inlined_call_operand.vmem [shape: bf16[64,256], index: 2, kind: input, shape index: {}]   ;;  %s3351_s5 = inlined_call_operand.vmem [shape: bf16[23,128,256], index: 5, kind: input, shape index: {}]   ;;  %s3352_s6 = inlined_call_operand.vmem [shape: f32[23,1,128], index: 6, kind: input, shape index: {}]   ;;  %s3353_s7 = inlined_call_operand.vmem [shape: bf16[128,128], index: 7, kind: input, shape index: {}]   ;;  %s3354_s8 = inlined_call_operand.vmem [shape: f32[1,128], index: 8, kind: input, shape index: {}]   ;;  %s3355_s9 = inlined_call_operand.vmem [shape: f32[128,128], index: 9, kind: output, shape index: {}]   ;;  %s3356_s0 = inlined_call_operand.vmem [shape: bf16[128,64], index: 0, kind: input, shape index: {}]   ;;  %s3357_s1 = inlined_call_operand.vmem [shape: bf16[128,128], index: 1, kind: input, shape index: {}]   ;;  %s3358_s4 = inlined_call_operand.vmem [shape: f32[1,128], index: 4, kind: input, shape index: {}]   ;;  %s3359_s3 = inlined_call_operand.vmem [shape: f32[1,128], index: 3, kind: input, shape index: {}]  }
   0x1   :  { %v2048_v0 = vld [vmem:[%s3350_s2 + $0x34] ss:$8 sps:$4 sm:$0xff]   ;;  %210 = vmatprep.mubr.bf16.mxu0 %v2436_v1  ;;  %v2050_v2 = vld [vmem:[%s3350_s2 + $0x30] ss:$8 sps:$4 sm:$0xff]   ;;  %v2051_v3 = vld [vmem:[%s3350_s2 + $0x24] ss:$8 sps:$4 sm:$0xff]  }
   0x2   :  { %186 = vmatprep.subr.bf16.mxu0 %v2048_v0  ;;  %v2053_v4 = vld [vmem:[%s3350_s2 + $0x20] ss:$8 sps:$4 sm:$0xff]   ;;  %v2054_v5 = vld [vmem:[%s3350_s2 + $0x14] ss:$8 sps:$4 sm:$0xff]   ;;  %v2056_v6 = vld [vmem:[%s3350_s2 + $0x10] ss:$8 sps:$4 sm:$0xff]  }
   0x3   :  { %187 = vmatpush1.bf16.msra.mxu0 %v2050_v2  ;;  %v2057_v7 = vld [vmem:[%s3350_s2 + $0x4] ss:$8 sps:$4 sm:$0xff]   ;;  %v2059_v8 = vld [vmem:[%s3350_s2] ss:$8 sps:$4 sm:$0xff]   ;;  %v2062_v11 = vld [vmem:[%s3356_s0 + $0x10] sm:$0xff]  }
   0x4   :  { %188 = vmatprep.subr.bf16.mxu0 %v2051_v3  ;;  %v2060_v9 = vld [vmem:[%s3356_s0] sm:$0xff]   ;;  %v2061_v10 = vld [vmem:[%s3356_s0 + $0x8] sm:$0xff]   ;;  %v2063_v12 = vld [vmem:[%s3356_s0 + $0x18] sm:$0xff]  }
   0x5   :  { %v2064_v13 = vld [vmem:[%s3356_s0 + $0x20] sm:$0xff]   ;;  %v2065_v14 = vld [vmem:[%s3356_s0 + $0x28] sm:$0xff]   ;;  %v2066_v15 = vld [vmem:[%s3356_s0 + $0x30] sm:$0xff]  }
   0x6   :  { %v2067_v16 = vld [vmem:[%s3356_s0 + $0x38] sm:$0xff]   ;;  %v2547_v17 = vld [vmem:[%s3357_s1] sm:$0xff]   ;;  %v2585_v58 = vld [vmem:[%s3357_s1 + $0x8] sm:$0xff]  }
   0x7   :  { %189 = vmatpush1.bf16.msra.mxu0 %v2053_v4  ;;  %3371 = vst [vmem:[#allocation2_spill] sm:$0xff] %v2547_v17  ;;  %1670 = vmatprep.mubr.bf16.mxu1 %v2547_v17  ;;  %3372 = vst [vmem:[#allocation3_spill] sm:$0xff] %v2585_v58  ;;  %v2590_v59 = vld [vmem:[%s3357_s1 + $0x10] sm:$0xff]   ;;  %v2597_v60 = vld [vmem:[%s3357_s1 + $0x18] sm:$0xff]  }
   0x8   :  { %190 = vmatprep.subr.bf16.mxu0 %v2054_v5  ;;  %3373 = vst [vmem:[#allocation4_spill] sm:$0xff] %v2590_v59  ;;  %3374 = vst [vmem:[#allocation5_spill] sm:$0xff] %v2597_v60  ;;  %v2602_v61 = vld [vmem:[%s3357_s1 + $0x20] sm:$0xff]   ;;  %v2609_v62 = vld [vmem:[%s3357_s1 + $0x28] sm:$0xff]  }
   0x9   :  { %3375 = vst [vmem:[#allocation6_spill] sm:$0xff] %v2602_v61  ;;  %3376 = vst [vmem:[#allocation7_spill] sm:$0xff] %v2609_v62  ;;  %v2614_v63 = vld [vmem:[%s3357_s1 + $0x30] sm:$0xff]   ;;  %v2621_v0 = vld [vmem:[%s3357_s1 + $0x38] sm:$0xff]   ;;  %s2767_s1 = smov 1  }
   0xa   :  { %3377 = vst [vmem:[#allocation8_spill] sm:$0xff] %v2614_v63  ;;  %3378 = vst [vmem:[#allocation9_spill] sm:$0xff] %v2621_v0  ;;  %v2633_v4 = vld [vmem:[%s3359_s3] ss:$0 sm:$0xff] }
   0xb   :  { %191 = vmatpush1.bf16.msra.mxu0 %v2056_v6 }
   0xc   :  { %192 = vmatprep.subr.bf16.mxu0 %v2057_v7 }
   0xf   :  { %193 = vmatpush1.bf16.msra.mxu0 %v2059_v8 }
  0x12   :  { %1542 = vmatmul.mubr.msk.bf16.vlgmr.msra.gmra.mxu0 %vm153_vm0, %v2060_v9 }
  0x13   :  { %220 = vmatprep.mubr.bf16.mxu0 %v2436_v1 }
  0x1a   :  { %1543 = vmatmul.mubr.msk.bf16.gmra.mxu0 %vm153_vm0, %v2061_v10 }
  0x1b   :  { %230 = vmatprep.mubr.bf16.mxu0 %v2436_v1 }
  0x22   :  { %1544 = vmatmul.mubr.msk.bf16.gmra.mxu0 %vm153_vm0, %v2062_v11 }
  0x23   :  { %240 = vmatprep.mubr.bf16.mxu0 %v2436_v1 }
  0x2a   :  { %1545 = vmatmul.mubr.msk.bf16.gmra.mxu0 %vm153_vm0, %v2063_v12 }
  0x2b   :  { %250 = vmatprep.mubr.bf16.mxu0 %v2436_v1 }
  0x32   :  { %1546 = vmatmul.mubr.msk.bf16.gmra.mxu0 %vm153_vm0, %v2064_v13 }
  0x33   :  { %260 = vmatprep.mubr.bf16.mxu0 %v2436_v1 }
  0x3a   :  { %1547 = vmatmul.mubr.msk.bf16.gmra.mxu0 %vm153_vm0, %v2065_v14 }
  0x3b   :  { %270 = vmatprep.mubr.bf16.mxu0 %v2436_v1 }
  0x42   :  { %1548 = vmatmul.mubr.msk.bf16.gmra.mxu0 %vm153_vm0, %v2066_v15 }
  0x43   :  { %280 = vmatprep.mubr.bf16.mxu0 %v2436_v1  ;;  %v2627_v1 = vld [vmem:[%s3358_s4] ss:$0 sm:$0xff] }
  0x4a   :  { %1549 = vmatmul.mubr.msk.bf16.gmra.mxu0 %vm153_vm0, %v2067_v16 }
  0xd2   :  { %v2550_v18 = vpop.f32.mrf.mxu0 }
  0xd3   :  { %v298_v10 = vadd.f32 %v2633_v4, %v2550_v18 }
  0xd4   :  { %v214_v19 = vpop.f32.mrf.mxu0 }
  0xd6   :  { %v2552_v20 = vpop.f32.mrf.mxu0 }
  0xd8   :  { %v218_v21 = vpop.f32.mrf.mxu0 }
  0xd9   :  { %v314_v22 = vpack.c.bf16 %v218_v21, %v214_v19 }
  0xda   :  { %v2554_v23 = vpop.f32.mrf.mxu0 }
  0xdb   :  { %v300_v6 = vadd.f32 %v2633_v4, %v2554_v23  ;;  %v299_v23 = vadd.f32 %v2633_v4, %v2552_v20 }
  0xdc   :  { %v224_v24 = vpop.f32.mrf.mxu0 }
  0xde   :  { %v2556_v25 = vpop.f32.mrf.mxu0 }
  0xdf   :  { %v301_v15 = vadd.f32 %v2633_v4, %v2556_v25 }
  0xe0   :  { %v228_v26 = vpop.f32.mrf.mxu0 }
  0xe1   :  { %v315_v27 = vpack.c.bf16 %v228_v26, %v224_v24 }
  0xe2   :  { %v2558_v28 = vpop.f32.mrf.mxu0 }
  0xe4   :  { %v234_v29 = vpop.f32.mrf.mxu0 }
  0xe6   :  { %v2560_v30 = vpop.f32.mrf.mxu0 }
  0xe8   :  { %v238_v31 = vpop.f32.mrf.mxu0 }
  0xe9   :  { %v316_v57 = vpack.c.bf16 %v238_v31, %v234_v29 }
  0xea   :  { %v2562_v32 = vpop.f32.mrf.mxu0 }
  0xeb   :  { %v304_v29 = vadd.f32 %v2633_v4, %v2562_v32 }
  0xec   :  { %v244_v33 = vpop.f32.mrf.mxu0 }
  0xee   :  { %v2564_v34 = vpop.f32.mrf.mxu0 }
  0xf0   :  { %v248_v35 = vpop.f32.mrf.mxu0 }
  0xf1   :  { %v317_v56 = vpack.c.bf16 %v248_v35, %v244_v33 }
  0xf2   :  { %v2566_v36 = vpop.f32.mrf.mxu0 }
  0xf4   :  { %v254_v37 = vpop.f32.mrf.mxu0 }
  0xf6   :  { %v2568_v38 = vpop.f32.mrf.mxu0 }
  0xf8   :  { %v258_v39 = vpop.f32.mrf.mxu0 }
  0xf9   :  { %v318_v55 = vpack.c.bf16 %v258_v39, %v254_v37  ;;  %v302_v37 = vadd.f32 %v2633_v4, %v2558_v28 }
  0xfa   :  { %v2570_v40 = vpop.f32.mrf.mxu0 }
  0xfc   :  { %v264_v41 = vpop.f32.mrf.mxu0 }
  0xfe   :  { %v2572_v42 = vpop.f32.mrf.mxu0 }
 0x100   :  { %v268_v43 = vpop.f32.mrf.mxu0 }
 0x101   :  { %v319_v54 = vpack.c.bf16 %v268_v43, %v264_v41 }
 0x102   :  { %v2574_v44 = vpop.f32.mrf.mxu0 }
 0x104   :  { %v274_v45 = vpop.f32.mrf.mxu0 }
 0x106   :  { %v2576_v46 = vpop.f32.mrf.mxu0 }
 0x108   :  { %v278_v47 = vpop.f32.mrf.mxu0 }
 0x109   :  { %v320_v53 = vpack.c.bf16 %v278_v47, %v274_v45  ;;  %v305_v45 = vadd.f32 %v2633_v4, %v2564_v34 }
 0x10a   :  { %v2578_v48 = vpop.f32.mrf.mxu0 }
 0x10c   :  { %v284_v49 = vpop.f32.mrf.mxu0 }
 0x10e   :  { %v2580_v50 = vpop.f32.mrf.mxu0 }
 0x110   :  { %v288_v51 = vpop.f32.mrf.mxu0 }
 0x111   :  { %v321_v52 = vpack.c.bf16 %v288_v51, %v284_v49 }
 0x113   :  { %1654 = vmatprep.subr.bf16.mxu1 %v321_v52 }
 0x114   :  { %1655 = vmatpush3.bf16.msra.mxu1 %v321_v52  ;;  %v303_v52 = vadd.f32 %v2633_v4, %v2560_v30 }
 0x115   :  { %1656 = vmatprep.subr.bf16.mxu1 %v320_v53 }
 0x118   :  { %1657 = vmatpush3.bf16.msra.mxu1 %v320_v53 }
 0x119   :  { %1658 = vmatprep.subr.bf16.mxu1 %v319_v54 }
 0x11c   :  { %1659 = vmatpush3.bf16.msra.mxu1 %v319_v54 }
 0x11d   :  { %1660 = vmatprep.subr.bf16.mxu1 %v318_v55 }
 0x120   :  { %1661 = vmatpush3.bf16.msra.mxu1 %v318_v55 }
 0x121   :  { %1662 = vmatprep.subr.bf16.mxu1 %v317_v56 }
 0x124   :  { %1663 = vmatpush3.bf16.msra.mxu1 %v317_v56  ;;  %v308_v56 = vadd.f32 %v2633_v4, %v2570_v40 }
 0x125   :  { %1664 = vmatprep.subr.bf16.mxu1 %v316_v57 }
 0x128   :  { %1665 = vmatpush3.bf16.msra.mxu1 %v316_v57 }
 0x129   :  { %1666 = vmatprep.subr.bf16.mxu1 %v315_v27 }
 0x12c   :  { %1667 = vmatpush3.bf16.msra.mxu1 %v315_v27 }
 0x12d   :  { %1668 = vmatprep.subr.bf16.mxu1 %v314_v22 }
 0x130   :  { %1669 = vmatpush3.bf16.msra.mxu1 %v314_v22 }
 0x133   :  { %1671 = vmatmul.mubr.bf16.vlgmr.msra.gmra.mxu1 %v2585_v58 }
 0x134   :  { %1674 = vmatprep.mubr.bf16.mxu1 %v2590_v59 }
 0x13b   :  { %1675 = vmatmul.mubr.bf16.gmra.mxu1 %v2597_v60 }
 0x13c   :  { %1678 = vmatprep.mubr.bf16.mxu1 %v2602_v61 }
 0x143   :  { %1679 = vmatmul.mubr.bf16.gmra.mxu1 %v2609_v62 }
 0x144   :  { %1682 = vmatprep.mubr.bf16.mxu1 %v2614_v63 }
 0x14b   :  { %1683 = vmatmul.mubr.bf16.gmra.mxu1 %v2621_v0 }
 0x1f3   :  { %v1672_v2 = vpop.f32.mrf.mxu1 }
 0x1f4   :  { %v420_v3 = vadd.f32 %v1672_v2, %v2627_v1 }
 0x1f5   :  { %v411_v5 = vpop.f32.mrf.mxu1 }
 0x1f6   :  { %v476_v7 = vmax.f32 %v420_v3, 0.0  ;;  %v412_v8 = vadd.f32 %v2627_v1, %v411_v5  ;;  %v306_v5 = vadd.f32 %v2633_v4, %v2566_v36 }
 0x1f7   :  { %v1673_v9 = vpop.f32.mrf.mxu1 }
 0x1f8   :  { %v2640_v11 = vadd.f32 %v476_v7, %v300_v6   ;;  %v474_v12 = vmax.f32 %v412_v8, 0.0  ;;  %v423_v13 = vadd.f32 %v1673_v9, %v2627_v1  ;;  %v309_v9 = vadd.f32 %v2633_v4, %v2572_v42 }
 0x1f9   :  { %v414_v14 = vpop.f32.mrf.mxu1 }
 0x1fa   :  { %v2645_v16 = vadd.f32 %v474_v12, %v298_v10   ;;  %v477_v19 = vmax.f32 %v423_v13, 0.0  ;;  %v415_v21 = vadd.f32 %v2627_v1, %v414_v14  ;;  %v307_v14 = vadd.f32 %v2633_v4, %v2568_v38 }
 0x1fb   :  { %v1676_v22 = vpop.f32.mrf.mxu1 }
 0x1fc   :  { %v2650_v24 = vadd.f32 %v477_v19, %v301_v15   ;;  %v475_v18 = vmax.f32 %v415_v21, 0.0  ;;  %v436_v26 = vadd.f32 %v1676_v22, %v2627_v1  ;;  %v312_v22 = vadd.f32 %v2633_v4, %v2578_v48 }
 0x1fd   :  { %v427_v27 = vpop.f32.mrf.mxu1 }
 0x1fe   :  { %v2655_v31 = vadd.f32 %v475_v18, %v299_v23   ;;  %v480_v25 = vmax.f32 %v436_v26, 0.0  ;;  %v428_v33 = vadd.f32 %v2627_v1, %v427_v27  ;;  %v310_v27 = vadd.f32 %v2633_v4, %v2574_v44 }
 0x1ff   :  { %v1677_v35 = vpop.f32.mrf.mxu1  ;;  %v2698_v44 = vmov 0.0  }
 0x200   :  { %v2660_v39 = vadd.f32 %v480_v25, %v304_v29   ;;  %v478_v20 = vmax.f32 %v428_v33, 0.0  ;;  %v439_v41 = vadd.f32 %v1677_v35, %v2627_v1  ;;  %v313_v35 = vadd.f32 %v2633_v4, %v2580_v50 }
 0x201   :  { %v430_v43 = vpop.f32.mrf.mxu1  ;;  %v2706_v50 = vmov 0.0  }
 0x202   :  { %v2665_v47 = vadd.f32 %v478_v20, %v302_v37   ;;  %v481_v32 = vmax.f32 %v439_v41, 0.0  ;;  %v431_v49 = vadd.f32 %v2627_v1, %v430_v43  ;;  %v311_v41 = vadd.f32 %v2633_v4, %v2576_v46 }
 0x203   :  { %v1680_v51 = vpop.f32.mrf.mxu1  ;;  %v2712_v46 = vmov 0.0   ;;  %v2714_v4 = vmov 0.0  }
 0x204   :  { %v2670_v53 = vadd.f32 %v481_v32, %v305_v45   ;;  %v479_v28 = vmax.f32 %v431_v49, 0.0  ;;  %v452_v54 = vadd.f32 %v1680_v51, %v2627_v1  ;;  %v2696_v49 = vmov 0.0  }
 0x205   :  { %v443_v55 = vpop.f32.mrf.mxu1  ;;  %v2700_v51 = vmov 0.0  }
 0x206   :  { %v495_v57 = vadd.f32 %v479_v28, %v303_v52   ;;  %v484_v34 = vmax.f32 %v452_v54, 0.0  ;;  %v444_v2 = vadd.f32 %v2627_v1, %v443_v55  ;;  %v2702_v52 = vmov 0.0  }
 0x207   :  { %v1681_v3 = vpop.f32.mrf.mxu1  ;;  %v2704_v28 = vmov 0.0   ;;  %v2708_v54 = vmov 0.0   ;;  %v2716_v55 = vmov 0.0  }
 0x208   :  { %v500_v6 = vadd.f32 %v484_v34, %v308_v56   ;;  %v482_v7 = vmax.f32 %v444_v2, 0.0  ;;  %v455_v30 = vadd.f32 %v1681_v3, %v2627_v1  ;;  %v2718_v56 = vmov 0.0  }
 0x209   :  { %v446_v8 = vpop.f32.mrf.mxu1  ;;  %v2720_v34 = vmov 0.0   ;;  %v2722_v2 = vmov 0.0   ;;  %v2724_v3 = vmov 0.0  }
 0x20a   :  { %v498_v10 = vadd.f32 %v482_v7, %v306_v5   ;;  %v485_v12 = vmax.f32 %v455_v30, 0.0  ;;  %v447_v40 = vadd.f32 %v2627_v1, %v446_v8  ;;  %v2726_v5 = vmov 0.0  }
 0x20b   :  { %v1684_v13 = vpop.f32.mrf.mxu1 }
 0x20c   :  { %v501_v15 = vadd.f32 %v485_v12, %v309_v9   ;;  %v483_v19 = vmax.f32 %v447_v40, 0.0  ;;  %v468_v36 = vadd.f32 %v1684_v13, %v2627_v1 }
 0x20d   :  { %v459_v21 = vpop.f32.mrf.mxu1 }
 0x20e   :  { %v499_v23 = vadd.f32 %v483_v19, %v307_v14   ;;  %v488_v18 = vmax.f32 %v468_v36, 0.0  ;;  %v460_v42 = vadd.f32 %v2627_v1, %v459_v21 }
 0x20f   :  { %v1685_v26 = vpop.f32.mrf.mxu1 }
 0x210   :  { %v504_v29 = vadd.f32 %v488_v18, %v312_v22   ;;  %v486_v25 = vmax.f32 %v460_v42, 0.0  ;;  %v471_v38 = vadd.f32 %v1685_v26, %v2627_v1 }
 0x211   :  { %v462_v33 = vpop.f32.mrf.mxu1 }
 0x212   :  { %v502_v37 = vadd.f32 %v486_v25, %v310_v27   ;;  %v489_v20 = vmax.f32 %v471_v38, 0.0  ;;  %v463_v48 = vadd.f32 %v2627_v1, %v462_v33  ;;  %v2710_v1 = vmov 0.0  }
 0x214   :  { %v505_v43 = vadd.f32 %v489_v20, %v313_v35   ;;  %v487_v45 = vmax.f32 %v463_v48, 0.0 }
 0x216   :  { %v503_v32 = vadd.f32 %v487_v45, %v311_v41  }
 0x217 LB: > { %v3379_v17 = vld [vmem:[#allocation2_spill] sm:$0xff]  ;;  %v2437_v7 = vmov 0   ;;  %s1560_s3 = sadd.s32 4294967295, %s2434_s1  ;;  %v544_v38 = vpack.c.bf16 %v2426_v31, %v2430_v16  ;;  %v545_v33 = vpack.c.bf16 %v2418_v24, %v2422_v11  ;;  %v546_v35 = vpack.c.bf16 %v2410_v57, %v2414_v47  ;;  %v3399_v58 = vld [vmem:[#allocation3_spill] sm:$0xff]  ;;  %v3400_v59 = vld [vmem:[#allocation4_spill] sm:$0xff]  ;;  %s511_s21 = sadd.s32 1, %s2434_s1   ;;  %s2434_s1 = sphi %s2767_s1, %s3455_s1   ;;  %v2430_v16 = vphi %v2645_v16, %v3454_v16   ;;  %v2426_v31 = vphi %v2655_v31, %v3453_v31   ;;  %v2422_v11 = vphi %v2640_v11, %v3452_v11   ;;  %v2418_v24 = vphi %v2650_v24, %v3451_v24   ;;  %v2414_v47 = vphi %v2665_v47, %v3450_v47   ;;  %v2410_v57 = vphi %v495_v57, %v3449_v57   ;;  %v2406_v39 = vphi %v2660_v39, %v3448_v39   ;;  %v2402_v53 = vphi %v2670_v53, %v3447_v53   ;;  %v2398_v10 = vphi %v498_v10, %v3446_v10   ;;  %v2394_v23 = vphi %v499_v23, %v3445_v23   ;;  %v2390_v6 = vphi %v500_v6, %v3444_v6   ;;  %v2386_v15 = vphi %v501_v15, %v3443_v15   ;;  %v2382_v37 = vphi %v502_v37, %v3442_v37   ;;  %v2378_v32 = vphi %v503_v32, %v3441_v32   ;;  %v2374_v29 = vphi %v504_v29, %v3440_v29   ;;  %v2370_v43 = vphi %v505_v43, %v3439_v43   ;;  %v2366_v5 = vphi %v2726_v5, %v3438_v5   ;;  %v2362_v3 = vphi %v2724_v3, %v3437_v3   ;;  %v2358_v2 = vphi %v2722_v2, %v3436_v2   ;;  %v2354_v34 = vphi %v2720_v34, %v3435_v34   ;;  %v2350_v56 = vphi %v2718_v56, %v3434_v56   ;;  %v2346_v55 = vphi %v2716_v55, %v3433_v55   ;;  %v2342_v4 = vphi %v2714_v4, %v3432_v4   ;;  %v2338_v46 = vphi %v2712_v46, %v3431_v46   ;;  %v2334_v1 = vphi %v2710_v1, %v3430_v1   ;;  %v2330_v54 = vphi %v2708_v54, %v3429_v54   ;;  %v2326_v50 = vphi %v2706_v50, %v3428_v50   ;;  %v2322_v28 = vphi %v2704_v28, %v3427_v28   ;;  %v2318_v52 = vphi %v2702_v52, %v3426_v52   ;;  %v2314_v51 = vphi %v2700_v51, %v3425_v51   ;;  %v2310_v44 = vphi %v2698_v44, %v3424_v44   ;;  %v2306_v49 = vphi %v2696_v49, %v3423_v49  }
 0x218   : > { %1702 = vmatprep.mubr.bf16.mxu1 %v3379_v17  ;;  %684 = vmatprep.mubr.bf16.mxu0 %v2437_v7  ;;  %s1589_s4 = sshll.u32 %s1560_s3, 7  ;;  %v547_v20 = vpack.c.bf16 %v2402_v53, %v2406_v39  ;;  %v548_v48 = vpack.c.bf16 %v2394_v23, %v2398_v10  ;;  %v549_v41 = vpack.c.bf16 %v2386_v15, %v2390_v6  ;;  %v3401_v60 = vld [vmem:[#allocation5_spill] sm:$0xff]  ;;  %v3402_v61 = vld [vmem:[#allocation6_spill] sm:$0xff]  ;;  %v3403_v62 = vld [vmem:[#allocation7_spill] sm:$0xff]  ;;  %s789_s0 = scalar_lea.vmem %s3352_s6, %s1560_s3 }
 0x219   : > { %s555_s18 = scalar_lea.vmem %s3351_s5, %s1589_s4  ;;  %v550_v45 = vpack.c.bf16 %v2378_v32, %v2382_v37  ;;  %v3404_v63 = vld [vmem:[#allocation8_spill] sm:$0xff]  ;;  %v3405_v0 = vld [vmem:[#allocation9_spill] sm:$0xff]  ;;  %p3006_p0 = scmp.ge.s32.totalorder %s511_s21, 24  }
 0x21a   : > { %v2076_v30 = vld [vmem:[%s555_s18 + $0x74] ss:$8 sps:$4 sm:$0xff]   ;;  %v2078_v8 = vld [vmem:[%s555_s18 + $0x70] ss:$8 sps:$4 sm:$0xff]   ;;  %v2079_v9 = vld [vmem:[%s555_s18 + $0x64] ss:$8 sps:$4 sm:$0xff]   ;;  %s3455_s1 = smov %s511_s21 }
 0x21b   : > { %652 = vmatprep.subr.bf16.mxu0 %v2076_v30  ;;  %v2081_v12 = vld [vmem:[%s555_s18 + $0x60] ss:$8 sps:$4 sm:$0xff]   ;;  %v2082_v40 = vld [vmem:[%s555_s18 + $0x54] ss:$8 sps:$4 sm:$0xff]   ;;  %v2084_v13 = vld [vmem:[%s555_s18 + $0x50] ss:$8 sps:$4 sm:$0xff]   ;;  %v551_v30 = vpack.c.bf16 %v2370_v43, %v2374_v29 }
 0x21c   : > { %653 = vmatpush1.bf16.msra.mxu0 %v2078_v8  ;;  %v2085_v14 = vld [vmem:[%s555_s18 + $0x44] ss:$8 sps:$4 sm:$0xff]   ;;  %v2087_v19 = vld [vmem:[%s555_s18 + $0x40] ss:$8 sps:$4 sm:$0xff]   ;;  %v2088_v36 = vld [vmem:[%s555_s18 + $0x34] ss:$8 sps:$4 sm:$0xff]  }
 0x21d   : > { %654 = vmatprep.subr.bf16.mxu0 %v2079_v9  ;;  %v2090_v21 = vld [vmem:[%s555_s18 + $0x30] ss:$8 sps:$4 sm:$0xff]   ;;  %v2091_v22 = vld [vmem:[%s555_s18 + $0x24] ss:$8 sps:$4 sm:$0xff]   ;;  %v2093_v18 = vld [vmem:[%s555_s18 + $0x20] ss:$8 sps:$4 sm:$0xff]  }
 0x21e   : > { %v2094_v42 = vld [vmem:[%s555_s18 + $0x14] ss:$8 sps:$4 sm:$0xff]   ;;  %v2096_v26 = vld [vmem:[%s555_s18 + $0x10] ss:$8 sps:$4 sm:$0xff]   ;;  %v2097_v27 = vld [vmem:[%s555_s18 + $0x4] ss:$8 sps:$4 sm:$0xff]  }
 0x21f   : > { %v2099_v25 = vld [vmem:[%s555_s18] ss:$8 sps:$4 sm:$0xff]  }
 0x220   : > { %655 = vmatpush1.bf16.msra.mxu0 %v2081_v12 }
 0x221   : > { %656 = vmatprep.subr.bf16.mxu0 %v2082_v40 }
 0x224   : > { %657 = vmatpush1.bf16.msra.mxu0 %v2084_v13 }
 0x225   : > { %658 = vmatprep.subr.bf16.mxu0 %v2085_v14 }
 0x228   : > { %659 = vmatpush1.bf16.msra.mxu0 %v2087_v19 }
 0x229   : > { %660 = vmatprep.subr.bf16.mxu0 %v2088_v36 }
 0x22c   : > { %661 = vmatpush1.bf16.msra.mxu0 %v2090_v21 }
 0x22d   : > { %662 = vmatprep.subr.bf16.mxu0 %v2091_v22 }
 0x230   : > { %663 = vmatpush1.bf16.msra.mxu0 %v2093_v18 }
 0x231   : > { %664 = vmatprep.subr.bf16.mxu0 %v2094_v42 }
 0x234   : > { %665 = vmatpush1.bf16.msra.mxu0 %v2096_v26 }
 0x235   : > { %666 = vmatprep.subr.bf16.mxu0 %v2097_v27 }
 0x238   : > { %667 = vmatpush1.bf16.msra.mxu0 %v2099_v25 }
 0x23b   : > { %685 = vmatmul.mubr.bf16.vlgmr.msra.gmra.mxu0 %v544_v38 }
 0x23c   : > { %694 = vmatprep.mubr.bf16.mxu0 %v2437_v7 }
 0x243   : > { %695 = vmatmul.mubr.bf16.gmra.mxu0 %v545_v33 }
 0x244   : > { %704 = vmatprep.mubr.bf16.mxu0 %v2437_v7 }
 0x24b   : > { %705 = vmatmul.mubr.bf16.gmra.mxu0 %v546_v35 }
 0x24c   : > { %714 = vmatprep.mubr.bf16.mxu0 %v2437_v7 }
 0x253   : > { %715 = vmatmul.mubr.bf16.gmra.mxu0 %v547_v20 }
 0x254   : > { %724 = vmatprep.mubr.bf16.mxu0 %v2437_v7 }
 0x25b   : > { %725 = vmatmul.mubr.bf16.gmra.mxu0 %v548_v48 }
 0x25c   : > { %734 = vmatprep.mubr.bf16.mxu0 %v2437_v7 }
 0x263   : > { %735 = vmatmul.mubr.bf16.gmra.mxu0 %v549_v41 }
 0x264   : > { %744 = vmatprep.mubr.bf16.mxu0 %v2437_v7 }
 0x26b   : > { %745 = vmatmul.mubr.bf16.gmra.mxu0 %v550_v45 }
 0x26c   : > { %754 = vmatprep.mubr.bf16.mxu0 %v2437_v7 }
 0x273   : > { %755 = vmatmul.mubr.bf16.gmra.mxu0 %v551_v30 }
 0x2fb   : > { %v686_v8 = vpop.f32.mrf.mxu0 }
 0x2fd   : > { %v688_v9 = vpop.f32.mrf.mxu0 }
 0x2fe   : > { %v2892_v5 = vadd.f32 %v2366_v5, %v688_v9  }
 0x2ff   : > { %v690_v40 = vpop.f32.mrf.mxu0 }
 0x300   : > { %3380 = vst [vmem:[#allocation10_spill] sm:$0xff] %v2892_v5  ;;  %v3381_v12 = vmov %v2892_v5  ;;  %v2894_v13 = vpack.c.bf16 %v690_v40, %v686_v8 }
 0x301   : > { %v692_v14 = vpop.f32.mrf.mxu0 }
 0x302   : > { %v2897_v3 = vadd.f32 %v2362_v3, %v692_v14  }
 0x303   : > { %v696_v36 = vpop.f32.mrf.mxu0 }
 0x304   : > { %3382 = vst [vmem:[#allocation11_spill] sm:$0xff] %v2897_v3  ;;  %v3383_v19 = vmov %v2897_v3 }
 0x305   : > { %v698_v21 = vpop.f32.mrf.mxu0 }
 0x306   : > { %v2900_v2 = vadd.f32 %v2358_v2, %v698_v21  }
 0x307   : > { %v700_v22 = vpop.f32.mrf.mxu0 }
 0x308   : > { %3384 = vst [vmem:[#allocation12_spill] sm:$0xff] %v2900_v2  ;;  %v3385_v7 = vmov %v2900_v2  ;;  %v782_v18 = vpack.c.bf16 %v700_v22, %v696_v36 }
 0x309   : > { %v702_v42 = vpop.f32.mrf.mxu0 }
 0x30a   : > { %v2903_v34 = vadd.f32 %v2354_v34, %v702_v42  }
 0x30b   : > { %v706_v27 = vpop.f32.mrf.mxu0 }
 0x30c   : > { %v3386_v26 = vmov %v2903_v34 }
 0x30d   : > { %v708_v5 = vpop.f32.mrf.mxu0 }
 0x30e   : > { %v2906_v56 = vadd.f32 %v2350_v56, %v708_v5  }
 0x30f   : > { %v710_v38 = vpop.f32.mrf.mxu0 }
 0x310   : > { %v3387_v25 = vmov %v2906_v56 }
 0x311   : > { %v712_v33 = vpop.f32.mrf.mxu0 }
 0x312   : > { %v2909_v55 = vadd.f32 %v2346_v55, %v712_v33  }
 0x313   : > { %v716_v3 = vpop.f32.mrf.mxu0 }
 0x314   : > { %v3388_v35 = vmov %v2909_v55 }
 0x315   : > { %v718_v20 = vpop.f32.mrf.mxu0 }
 0x316   : > { %v2912_v4 = vadd.f32 %v2342_v4, %v718_v20  }
 0x317   : > { %v720_v2 = vpop.f32.mrf.mxu0 }
 0x318   : > { %v3389_v48 = vmov %v2912_v4 }
 0x319   : > { %v722_v41 = vpop.f32.mrf.mxu0 }
 0x31a   : > { %v2915_v46 = vadd.f32 %v2338_v46, %v722_v41  }
 0x31b   : > { %v726_v34 = vpop.f32.mrf.mxu0 }
 0x31c   : > { %v3390_v45 = vmov %v2915_v46 }
 0x31d   : > { %v728_v30 = vpop.f32.mrf.mxu0 }
 0x31e   : > { %v2918_v1 = vadd.f32 %v2334_v1, %v728_v30  }
 0x31f   : > { %v730_v56 = vpop.f32.mrf.mxu0 }
 0x320   : > { %v3391_v8 = vmov %v2918_v1 }
 0x321   : > { %v732_v9 = vpop.f32.mrf.mxu0 }
 0x322   : > { %v2921_v54 = vadd.f32 %v2330_v54, %v732_v9  }
 0x323   : > { %v736_v55 = vpop.f32.mrf.mxu0 }
 0x324   : > { %v3392_v40 = vmov %v2921_v54 }
 0x325   : > { %v738_v14 = vpop.f32.mrf.mxu0 }
 0x326   : > { %v2924_v50 = vadd.f32 %v2326_v50, %v738_v14  }
 0x327   : > { %v740_v4 = vpop.f32.mrf.mxu0 }
 0x328   : > { %v3393_v36 = vmov %v2924_v50 }
 0x329   : > { %v742_v21 = vpop.f32.mrf.mxu0 }
 0x32a   : > { %v2927_v28 = vadd.f32 %v2322_v28, %v742_v21  }
 0x32b   : > { %v746_v46 = vpop.f32.mrf.mxu0 }
 0x32c   : > { %v3394_v22 = vmov %v2927_v28  ;;  %v785_v28 = vpack.c.bf16 %v730_v56, %v726_v34 }
 0x32d   : > { %v748_v42 = vpop.f32.mrf.mxu0 }
 0x32e   : > { %v2930_v52 = vadd.f32 %v2318_v52, %v748_v42  }
 0x32f   : > { %v750_v1 = vpop.f32.mrf.mxu0 }
 0x330   : > { %v3395_v33 = vmov %v2930_v52  ;;  %v787_v21 = vpack.c.bf16 %v750_v1, %v746_v46  ;;  %v786_v52 = vpack.c.bf16 %v740_v4, %v736_v55 }
 0x331   : > { %v752_v5 = vpop.f32.mrf.mxu0 }
 0x332   : > { %v2933_v51 = vadd.f32 %v2314_v51, %v752_v5  }
 0x333   : > { %v756_v54 = vpop.f32.mrf.mxu0 }
 0x334   : > { %v3396_v20 = vmov %v2933_v51  ;;  %v784_v51 = vpack.c.bf16 %v720_v2, %v716_v3 }
 0x335   : > { %v758_v41 = vpop.f32.mrf.mxu0 }
 0x336   : > { %v2936_v44 = vadd.f32 %v2310_v44, %v758_v41  }
 0x337   : > { %v760_v50 = vpop.f32.mrf.mxu0 }
 0x338   : > { %v3397_v30 = vmov %v2936_v44  ;;  %v788_v9 = vpack.c.bf16 %v760_v50, %v756_v54  ;;  %v783_v44 = vpack.c.bf16 %v710_v38, %v706_v27 }
 0x339   : > { %v762_v14 = vpop.f32.mrf.mxu0 }
 0x33a   : > { %v2939_v49 = vadd.f32 %v2306_v49, %v762_v14   ;;  %1686 = vmatprep.subr.bf16.mxu1 %v788_v9 }
 0x33b   : > { %1687 = vmatpush3.bf16.msra.mxu1 %v788_v9 }
 0x33c   : > { %v3398_v17 = vmov %v2939_v49  ;;  %1688 = vmatprep.subr.bf16.mxu1 %v787_v21  ;;  %v1579_v49 = vld [vmem:[%s789_s0] ss:$0 sm:$0xff] }
 0x33f   : > { %1689 = vmatpush3.bf16.msra.mxu1 %v787_v21 }
 0x340   : > { %1690 = vmatprep.subr.bf16.mxu1 %v786_v52 }
 0x343   : > { %1691 = vmatpush3.bf16.msra.mxu1 %v786_v52 }
 0x344   : > { %1692 = vmatprep.subr.bf16.mxu1 %v785_v28 }
 0x347   : > { %1693 = vmatpush3.bf16.msra.mxu1 %v785_v28 }
 0x348   : > { %1694 = vmatprep.subr.bf16.mxu1 %v784_v51 }
 0x34b   : > { %1695 = vmatpush3.bf16.msra.mxu1 %v784_v51 }
 0x34c   : > { %1696 = vmatprep.subr.bf16.mxu1 %v783_v44 }
 0x34f   : > { %1697 = vmatpush3.bf16.msra.mxu1 %v783_v44 }
 0x350   : > { %1698 = vmatprep.subr.bf16.mxu1 %v782_v18 }
 0x353   : > { %1699 = vmatpush3.bf16.msra.mxu1 %v782_v18 }
 0x354   : > { %1700 = vmatprep.subr.bf16.mxu1 %v2894_v13 }
 0x357   : > { %1701 = vmatpush3.bf16.msra.mxu1 %v2894_v13 }
 0x35a   : > { %1703 = vmatmul.mubr.bf16.vlgmr.msra.gmra.mxu1 %v3399_v58 }
 0x35b   : > { %1706 = vmatprep.mubr.bf16.mxu1 %v3400_v59 }
 0x362   : > { %1707 = vmatmul.mubr.bf16.gmra.mxu1 %v3401_v60 }
 0x363   : > { %1710 = vmatprep.mubr.bf16.mxu1 %v3402_v61 }
 0x36a   : > { %1711 = vmatmul.mubr.bf16.gmra.mxu1 %v3403_v62 }
 0x36b   : > { %1714 = vmatprep.mubr.bf16.mxu1 %v3404_v63 }
 0x372   : > { %1715 = vmatmul.mubr.bf16.gmra.mxu1 %v3405_v0 }
 0x41a   : > { %v1704_v13 = vpop.f32.mrf.mxu1 }
 0x41b   : > { %v840_v18 = vadd.f32 %v1704_v13, %v1579_v49 }
 0x41c   : > { %v831_v27 = vpop.f32.mrf.mxu1 }
 0x41d   : > { %v896_v38 = vmax.f32 %v840_v18, 0.0  ;;  %v832_v3 = vadd.f32 %v1579_v49, %v831_v27 }
 0x41e   : > { %v1705_v2 = vpop.f32.mrf.mxu1 }
 0x41f   : > { %v2956_v11 = vadd.f32 %v2422_v11, %v896_v38   ;;  %v894_v34 = vmax.f32 %v832_v3, 0.0  ;;  %v843_v56 = vadd.f32 %v1705_v2, %v1579_v49 }
 0x420   : > { %v834_v55 = vpop.f32.mrf.mxu1 }
 0x421   : > { %v3406_v42 = vmov %v2956_v11  ;;  %v2959_v16 = vadd.f32 %v2430_v16, %v894_v34   ;;  %v897_v4 = vmax.f32 %v843_v56, 0.0  ;;  %v835_v46 = vadd.f32 %v1579_v49, %v834_v55 }
 0x422   : > { %v1708_v1 = vpop.f32.mrf.mxu1 }
 0x423   : > { %v3407_v41 = vmov %v2959_v16  ;;  %v2962_v24 = vadd.f32 %v2418_v24, %v897_v4   ;;  %v895_v5 = vmax.f32 %v835_v46, 0.0  ;;  %v856_v54 = vadd.f32 %v1708_v1, %v1579_v49 }
 0x424   : > { %v847_v50 = vpop.f32.mrf.mxu1 }
 0x425   : > { %v3408_v9 = vmov %v2962_v24  ;;  %v2965_v31 = vadd.f32 %v2426_v31, %v895_v5   ;;  %v900_v21 = vmax.f32 %v856_v54, 0.0  ;;  %v848_v11 = vadd.f32 %v1579_v49, %v847_v50 }
 0x426   : > { %v1709_v52 = vpop.f32.mrf.mxu1 }
 0x427   : > { %v3409_v14 = vmov %v2965_v31  ;;  %v2968_v39 = vadd.f32 %v2406_v39, %v900_v21   ;;  %v898_v28 = vmax.f32 %v848_v11, 0.0  ;;  %v859_v16 = vadd.f32 %v1709_v52, %v1579_v49 }
 0x428   : > { %v850_v51 = vpop.f32.mrf.mxu1 }
 0x429   : > { %v3410_v13 = vmov %v2968_v39  ;;  %v2971_v47 = vadd.f32 %v2414_v47, %v898_v28   ;;  %v901_v44 = vmax.f32 %v859_v16, 0.0  ;;  %v851_v24 = vadd.f32 %v1579_v49, %v850_v51 }
 0x42a   : > { %v1712_v27 = vpop.f32.mrf.mxu1 }
 0x42b   : > { %v3411_v18 = vmov %v2971_v47  ;;  %v2974_v53 = vadd.f32 %v2402_v53, %v901_v44   ;;  %v899_v3 = vmax.f32 %v851_v24, 0.0  ;;  %v872_v31 = vadd.f32 %v1712_v27, %v1579_v49 }
 0x42c   : > { %v863_v2 = vpop.f32.mrf.mxu1  ;;  %v3424_v44 = vmov %v3397_v30  ;;  %v3451_v24 = vmov %v3408_v9 }
 0x42d   : > { %v3412_v38 = vmov %v2974_v53  ;;  %v2977_v57 = vadd.f32 %v2410_v57, %v899_v3   ;;  %v904_v34 = vmax.f32 %v872_v31, 0.0  ;;  %v864_v39 = vadd.f32 %v1579_v49, %v863_v2 }
 0x42e   : > { %v1713_v56 = vpop.f32.mrf.mxu1  ;;  %v3436_v2 = vmov %v3385_v7  ;;  %v3437_v3 = vmov %v3383_v19  ;;  %v3453_v31 = vmov %v3409_v14  ;;  %v3456_v19 = vld [vmem:[#allocation2_spill] sm:$0xff] (%p3006_p0)  ;;  %v2101_v7 = vld [vmem:[%s3353_s7 + $0x30] sm:$0xff] (%p3006_p0)  }
 0x42f   : > { %v3413_v0 = vmov %v2977_v57  ;;  %v2980_v6 = vadd.f32 %v2390_v6, %v904_v34   ;;  %v902_v55 = vmax.f32 %v864_v39, 0.0  ;;  %v875_v47 = vadd.f32 %v1713_v56, %v1579_v49  ;;  %1766 = vmatprep.mubr.bf16.mxu1 (%p3006_p0), %v3456_v19 }
 0x430   : > { %v866_v4 = vpop.f32.mrf.mxu1  ;;  %v3434_v56 = vmov %v3387_v25  ;;  %v3435_v34 = vmov %v3386_v26  ;;  %v3448_v39 = vmov %v3410_v13  ;;  %v927_v19 = vpack.c.bf16 (%p3006_p0), %v3408_v9, %v3406_v42 }
 0x431   : > { %v3414_v21 = vmov %v2980_v6  ;;  %v2983_v10 = vadd.f32 %v2398_v10, %v902_v55   ;;  %v905_v46 = vmax.f32 %v875_v47, 0.0  ;;  %v867_v53 = vadd.f32 %v1579_v49, %v866_v4 }
 0x432   : > { %v1716_v1 = vpop.f32.mrf.mxu1  ;;  %v3432_v4 = vmov %v3389_v48  ;;  %v3433_v55 = vmov %v3388_v35  ;;  %v3450_v47 = vmov %v3411_v18 }
 0x433   : > { %v3415_v63 = vmov %v2983_v10  ;;  %v2986_v15 = vadd.f32 %v2386_v15, %v905_v46   ;;  %v903_v5 = vmax.f32 %v867_v53, 0.0  ;;  %v888_v57 = vadd.f32 %v1716_v1, %v1579_v49 }
 0x434   : > { %v879_v54 = vpop.f32.mrf.mxu1  ;;  %v3430_v1 = vmov %v3391_v8  ;;  %v3431_v46 = vmov %v3390_v45  ;;  %v3447_v53 = vmov %v3412_v38 }
 0x435   : > { %v3416_v27 = vmov %v2986_v15  ;;  %v2989_v23 = vadd.f32 %v2394_v23, %v903_v5   ;;  %v908_v50 = vmax.f32 %v888_v57, 0.0  ;;  %v880_v6 = vadd.f32 %v1579_v49, %v879_v54 }
 0x436   : > { %v1717_v11 = vpop.f32.mrf.mxu1  ;;  %v3429_v54 = vmov %v3392_v40  ;;  %v3438_v5 = vmov %v3381_v12  ;;  %v3449_v57 = vmov %v3413_v0  ;;  %v926_v12 = vpack.c.bf16 (%p3006_p0), %v3409_v14, %v3407_v41 }
 0x437   : > { %v3417_v62 = vmov %v2989_v23  ;;  %v2992_v29 = vadd.f32 %v2374_v29, %v908_v50   ;;  %v906_v52 = vmax.f32 %v880_v6, 0.0  ;;  %v891_v10 = vadd.f32 %v1717_v11, %v1579_v49 }
 0x438   : > { %v882_v28 = vpop.f32.mrf.mxu1  ;;  %v3428_v50 = vmov %v3393_v36  ;;  %v3444_v6 = vmov %v3414_v21  ;;  %v3445_v23 = vmov %v3417_v62  ;;  %v3452_v11 = vmov %v3406_v42  ;;  %1734 = vmatprep.mubr.bf16.mxu0 (%p3006_p0), %v926_v12  ;;  %v2107_v12 = vld [vmem:[%s3353_s7] sm:$0xff] (%p3006_p0)  }
 0x439   : > { %v3418_v61 = vmov %v2992_v29  ;;  %v2995_v37 = vadd.f32 %v2382_v37, %v906_v52   ;;  %v909_v16 = vmax.f32 %v891_v10, 0.0  ;;  %v883_v15 = vadd.f32 %v1579_v49, %v882_v28  ;;  %v2102_v23 = vld [vmem:[%s3353_s7 + $0x28] sm:$0xff] (%p3006_p0)  }
 0x43a   : > { %v3423_v49 = vmov %v3398_v17  ;;  %v3426_v52 = vmov %v3395_v33  ;;  %v3427_v28 = vmov %v3394_v22  ;;  %v3440_v29 = vmov %v3418_v61  ;;  %v3458_v50 = vld [vmem:[#allocation11_spill] sm:$0xff] (%p3006_p0) }
 0x43b   : > { %v3419_v60 = vmov %v2995_v37  ;;  %v2998_v43 = vadd.f32 %v2370_v43, %v909_v16   ;;  %v907_v51 = vmax.f32 %v883_v15, 0.0  ;;  %v3443_v15 = vmov %v3416_v27  ;;  %v2103_v29 = vld [vmem:[%s3353_s7 + $0x20] sm:$0xff] (%p3006_p0)   ;;  %v3464_v28 = vld [vmem:[#allocation7_spill] sm:$0xff] (%p3006_p0) }
 0x43c   : > { %v3442_v37 = vmov %v3419_v60  ;;  %v3446_v10 = vmov %v3415_v63  ;;  %v3454_v16 = vmov %v3407_v41  ;;  %510 = sbr.rel (!%p3006_p0) target bundleno = 535 (0x217), region = 65  ;;  %v929_v49 = vpack.c.bf16 (%p3006_p0), %v3412_v38, %v3410_v13  ;;  %v3465_v15 = vld [vmem:[#allocation8_spill] sm:$0xff] (%p3006_p0) }
 0x43d   : > { %v3420_v59 = vmov %v2998_v43  ;;  %v3001_v32 = vadd.f32 %v2378_v32, %v907_v51   ;;  %v3425_v51 = vmov %v3396_v20  ;;  %v2100_v16 = vld [vmem:[%s3353_s7 + $0x38] sm:$0xff] (%p3006_p0)   ;;  %v930_v41 = vpack.c.bf16 (%p3006_p0), %v3417_v62, %v3415_v63  ;;  %v3463_v10 = vld [vmem:[#allocation6_spill] sm:$0xff] (%p3006_p0) }
 0x43e   : > { %v3439_v43 = vmov %v3420_v59  ;;  %1718 = vmatprep.subr.bf16.mxu0 (%p3006_p0), %v2100_v16  ;;  %v2104_v37 = vld [vmem:[%s3353_s7 + $0x18] sm:$0xff] (%p3006_p0)   ;;  %v931_v14 = vpack.c.bf16 (%p3006_p0), %v3416_v27, %v3414_v21 }
 0x43f   : > { %v3421_v58 = vmov %v3001_v32  ;;  %1719 = vmatpush3.bf16.msra.mxu0 (%p3006_p0), %v2100_v16  ;;  %v2105_v43 = vld [vmem:[%s3353_s7 + $0x10] sm:$0xff] (%p3006_p0)   ;;  %v3466_v51 = vld [vmem:[#allocation9_spill] sm:$0xff] (%p3006_p0)  ;;  %v1223_v16 = vlaneseq (%p3006_p0) }
 0x440   : > { %v3441_v32 = vmov %v3421_v58  ;;  %1720 = vmatprep.subr.bf16.mxu0 (%p3006_p0), %v2101_v7  ;;  %v932_v42 = vpack.c.bf16 (%p3006_p0), %v3421_v58, %v3419_v60 }
 0x441   :  { %v2106_v32 = vld [vmem:[%s3353_s7 + $0x8] sm:$0xff]  }
 0x443   :  { %1721 = vmatpush3.bf16.msra.mxu0 %v2101_v7  ;;  %v928_v7 = vpack.c.bf16 %v3413_v0, %v3411_v18  ;;  %v933_v0 = vpack.c.bf16 %v3420_v59, %v3418_v61 }
 0x444   :  { %1722 = vmatprep.subr.bf16.mxu0 %v2102_v23 }
 0x447   :  { %1723 = vmatpush3.bf16.msra.mxu0 %v2102_v23  ;;  %v3176_v23 = vand.u32 127, %v1223_v16 }
 0x448   :  { %1724 = vmatprep.subr.bf16.mxu0 %v2103_v29 }
 0x449   :  { %vm1225_vm1 = vcmp.lt.s32.totalorder %v3176_v23, 16 }
 0x44b   :  { %1725 = vmatpush3.bf16.msra.mxu0 %v2103_v29  ;;  %v1588_v29 = vld [vmem:[%s3354_s8] ss:$0 sm:$0xff] }
 0x44c   :  { %1726 = vmatprep.subr.bf16.mxu0 %v2104_v37 }
 0x44f   :  { %1727 = vmatpush3.bf16.msra.mxu0 %v2104_v37 }
 0x450   :  { %1728 = vmatprep.subr.bf16.mxu0 %v2105_v43 }
 0x453   :  { %1729 = vmatpush3.bf16.msra.mxu0 %v2105_v43 }
 0x454   :  { %1730 = vmatprep.subr.bf16.mxu0 %v2106_v32 }
 0x457   :  { %1731 = vmatpush3.bf16.msra.mxu0 %v2106_v32 }
 0x458   :  { %1732 = vmatprep.subr.bf16.mxu0 %v2107_v12 }
 0x45b   :  { %1733 = vmatpush3.bf16.msra.mxu0 %v2107_v12 }
 0x45e   :  { %1735 = vmatmul.mubr.bf16.vlgmr.msra.gmra.mxu0 %v927_v19 }
 0x45f   :  { %1738 = vmatprep.mubr.bf16.mxu0 %v928_v7 }
 0x466   :  { %1739 = vmatmul.mubr.bf16.gmra.mxu0 %v929_v49 }
 0x467   :  { %1742 = vmatprep.mubr.bf16.mxu0 %v930_v41 }
 0x46e   :  { %1743 = vmatmul.mubr.bf16.gmra.mxu0 %v931_v14 }
 0x46f   :  { %1746 = vmatprep.mubr.bf16.mxu0 %v932_v42 }
 0x476   :  { %1747 = vmatmul.mubr.bf16.gmra.mxu0 %v933_v0 }
 0x51e   :  { %v1736_v9 = vpop.f32.mrf.mxu0 }
 0x520   :  { %v1032_v18 = vpop.f32.mrf.mxu0 }
 0x522   :  { %v1737_v13 = vpop.f32.mrf.mxu0 }
 0x524   :  { %v1035_v44 = vpop.f32.mrf.mxu0 }
 0x525   :  { %v1096_v6 = vadd.f32 %v1035_v44, %v3458_v50 }
 0x526   :  { %v1740_v24 = vpop.f32.mrf.mxu0 }
 0x528   :  { %v1048_v62 = vpop.f32.mrf.mxu0 }
 0x52a   :  { %v1741_v63 = vpop.f32.mrf.mxu0 }
 0x52c   :  { %v1051_v38 = vpop.f32.mrf.mxu0 }
 0x52d   :  { %v1100_v5 = vadd.f32 %v1051_v38, %v3388_v35  ;;  %v3461_v35 = vld [vmem:[#allocation4_spill] sm:$0xff] }
 0x52e   :  { %v1744_v3 = vpop.f32.mrf.mxu0 }
 0x52f   :  { %v1105_v53 = vadd.f32 %v1744_v3, %v3393_v36  ;;  %v1099_v36 = vadd.f32 %v1048_v62, %v3387_v25  ;;  %v3460_v25 = vld [vmem:[#allocation3_spill] sm:$0xff] }
 0x530   :  { %v1064_v31 = vpop.f32.mrf.mxu0 }
 0x531   :  { %v1113_v57 = vpack.c.bf16 %v1100_v5, %v1099_v36 }
 0x532   :  { %v1745_v2 = vpop.f32.mrf.mxu0 }
 0x533   :  { %v1106_v4 = vadd.f32 %v1745_v2, %v3394_v22 }
 0x534   :  { %v1067_v34 = vpop.f32.mrf.mxu0 }
 0x535   :  { %v1116_v1 = vpack.c.bf16 %v1106_v4, %v1105_v53  ;;  %v1104_v27 = vadd.f32 %v1067_v34, %v3392_v40  ;;  %v1098_v40 = vadd.f32 %v1737_v13, %v3386_v26  ;;  %v3462_v26 = vld [vmem:[#allocation5_spill] sm:$0xff] }
 0x536   :  { %v1748_v39 = vpop.f32.mrf.mxu0 }
 0x537   :  { %v1109_v56 = vadd.f32 %v1748_v39, %v3397_v30 }
 0x538   :  { %v1080_v58 = vpop.f32.mrf.mxu0 }
 0x539   :  { %v1107_v21 = vadd.f32 %v1080_v58, %v3395_v33  ;;  %v1102_v33 = vadd.f32 %v1741_v63, %v3390_v45 }
 0x53a   :  { %v1749_v60 = vpop.f32.mrf.mxu0 }
 0x53b   :  { %v1110_v59 = vadd.f32 %v1749_v60, %v3398_v17  ;;  %v1103_v17 = vadd.f32 %v1064_v31, %v3391_v8  ;;  %v3457_v8 = vld [vmem:[#allocation12_spill] sm:$0xff] }
 0x53c   :  { %v1083_v61 = vpop.f32.mrf.mxu0  ;;  %v1097_v54 = vadd.f32 %v1736_v9, %v3457_v8 }
 0x53d   :  { %v1108_v55 = vadd.f32 %v1083_v61, %v3396_v20  ;;  %v1118_v47 = vpack.c.bf16 %v1110_v59, %v1109_v56  ;;  %v1115_v30 = vpack.c.bf16 %v1104_v27, %v1103_v17  ;;  %v1101_v20 = vadd.f32 %v1740_v24, %v3389_v48  ;;  %v3459_v48 = vld [vmem:[#allocation10_spill] sm:$0xff] }
 0x53e   :  { %v1112_v45 = vpack.c.bf16 %v1098_v40, %v1097_v54  ;;  %v1095_v11 = vadd.f32 %v1032_v18, %v3459_v48 }
 0x53f   :  { %v1117_v46 = vpack.c.bf16 %v1108_v55, %v1107_v21  ;;  %1750 = vmatprep.subr.bf16.mxu1 %v1118_v47  ;;  %v1114_v22 = vpack.c.bf16 %v1102_v33, %v1101_v20 }
 0x540   :  { %1751 = vmatpush3.bf16.msra.mxu1 %v1118_v47  ;;  %v1111_v52 = vpack.c.bf16 %v1096_v6, %v1095_v11 }
 0x541   :  { %1752 = vmatprep.subr.bf16.mxu1 %v1117_v46 }
 0x544   :  { %1753 = vmatpush3.bf16.msra.mxu1 %v1117_v46 }
 0x545   :  { %1754 = vmatprep.subr.bf16.mxu1 %v1116_v1 }
 0x548   :  { %1755 = vmatpush3.bf16.msra.mxu1 %v1116_v1 }
 0x549   :  { %1756 = vmatprep.subr.bf16.mxu1 %v1115_v30 }
 0x54c   :  { %1757 = vmatpush3.bf16.msra.mxu1 %v1115_v30 }
 0x54d   :  { %1758 = vmatprep.subr.bf16.mxu1 %v1114_v22 }
 0x550   :  { %1759 = vmatpush3.bf16.msra.mxu1 %v1114_v22 }
 0x551   :  { %1760 = vmatprep.subr.bf16.mxu1 %v1113_v57 }
 0x554   :  { %1761 = vmatpush3.bf16.msra.mxu1 %v1113_v57 }
 0x555   :  { %1762 = vmatprep.subr.bf16.mxu1 %v1112_v45 }
 0x558   :  { %1763 = vmatpush3.bf16.msra.mxu1 %v1112_v45 }
 0x559   :  { %1764 = vmatprep.subr.bf16.mxu1 %v1111_v52 }
 0x55c   :  { %1765 = vmatpush3.bf16.msra.mxu1 %v1111_v52 }
 0x55f   :  { %1767 = vmatmul.mubr.bf16.vlgmr.msra.gmra.mxu1 %v3460_v25 }
 0x560   :  { %1770 = vmatprep.mubr.bf16.mxu1 %v3461_v35 }
 0x567   :  { %1771 = vmatmul.mubr.bf16.gmra.mxu1 %v3462_v26 }
 0x568   :  { %1774 = vmatprep.mubr.bf16.mxu1 %v3463_v10 }
 0x56f   :  { %1775 = vmatmul.mubr.bf16.gmra.mxu1 %v3464_v28 }
 0x570   :  { %1778 = vmatprep.mubr.bf16.mxu1 %v3465_v15 }
 0x577   :  { %1779 = vmatmul.mubr.bf16.gmra.mxu1 %v3466_v51 }
 0x61f   :  { %v1768_v37 = vpop.f32.mrf.mxu1 }
 0x620   :  { %v1169_v43 = vadd.f32 %v1768_v37, %v1588_v29 }
 0x621   :  { %v1160_v32 = vpop.f32.mrf.mxu1 }
 0x622   :  { %v1161_v12 = vadd.f32 %v1588_v29, %v1160_v32  ;;  %v1228_v19 = vsel %vm1225_vm1, %v1169_v43, -inf }
 0x623   :  { %1246 = vmax.xlane.f32.xlu1 %v1228_v19  ;;  %v1769_v7 = vpop.f32.mrf.mxu1 }
 0x624   :  { %v1172_v49 = vadd.f32 %v1769_v7, %v1588_v29  ;;  %v1226_v41 = vsel %vm1225_vm1, %v1161_v12, -inf }
 0x625   :  { %v1163_v14 = vpop.f32.mrf.mxu1  ;;  %1242 = vmax.xlane.f32.xlu0 %v1226_v41 }
 0x626   :  { %v1164_v42 = vadd.f32 %v1588_v29, %v1163_v14  ;;  %v1229_v0 = vsel %vm1225_vm1, %v1172_v49, -inf }
 0x627   :  { %1248 = vmax.xlane.f32.xlu1 %v1229_v0  ;;  %v1772_v9 = vpop.f32.mrf.mxu1 }
 0x628   :  { %v1185_v18 = vadd.f32 %v1772_v9, %v1588_v29  ;;  %v1227_v13 = vsel %vm1225_vm1, %v1164_v42, -inf }
 0x629   :  { %v1176_v44 = vpop.f32.mrf.mxu1  ;;  %1244 = vmax.xlane.f32.xlu0 %v1227_v13 }
 0x62a   :  { %v1177_v62 = vadd.f32 %v1588_v29, %v1176_v44  ;;  %v1232_v38 = vsel %vm1225_vm1, %v1185_v18, -inf }
 0x62b   :  { %v1773_v24 = vpop.f32.mrf.mxu1 }
 0x62c   :  { %v1188_v63 = vadd.f32 %v1773_v24, %v1588_v29  ;;  %v1230_v58 = vsel %vm1225_vm1, %v1177_v62, -inf }
 0x62d   :  { %v1179_v3 = vpop.f32.mrf.mxu1  ;;  %1254 = vmax.xlane.f32.xlu0 %v1232_v38 }
 0x62e   :  { %v1180_v31 = vadd.f32 %v1588_v29, %v1179_v3  ;;  %v1233_v2 = vsel %vm1225_vm1, %v1188_v63, -inf }
 0x62f   :  { %1256 = vmax.xlane.f32.xlu1 %v1233_v2  ;;  %v1776_v34 = vpop.f32.mrf.mxu1 }
 0x630   :  { %v1201_v39 = vadd.f32 %v1776_v34, %v1588_v29  ;;  %v1231_v56 = vsel %vm1225_vm1, %v1180_v31, -inf }
 0x631   :  { %v1192_v60 = vpop.f32.mrf.mxu1  ;;  %1250 = vmax.xlane.f32.xlu0 %v1230_v58 }
 0x632   :  { %v1193_v61 = vadd.f32 %v1588_v29, %v1192_v60  ;;  %v1236_v55 = vsel %vm1225_vm1, %v1201_v39, -inf }
 0x633   :  { %v1777_v59 = vpop.f32.mrf.mxu1  ;;  %1252 = vmax.xlane.f32.xlu1 %v1231_v56 }
 0x634   :  { %v1204_v21 = vadd.f32 %v1777_v59, %v1588_v29  ;;  %v3204_v1 = vsel %vm1225_vm1, %v1193_v61, -inf }
 0x635   :  { %v1195_v47 = vpop.f32.mrf.mxu1  ;;  %1262 = vmax.xlane.f32.xlu0 %v1236_v55 }
 0x636   :  { %v1196_v4 = vadd.f32 %v1588_v29, %v1195_v47  ;;  %v1237_v46 = vsel %vm1225_vm1, %v1204_v21, -inf }
 0x637   :  { %v1780_v53 = vpop.f32.mrf.mxu1  ;;  %1264 = vmax.xlane.f32.xlu1 %v1237_v46 }
 0x638   :  { %v3209_v33 = vsel %vm1225_vm1, %v1196_v4, -inf  ;;  %v1217_v20 = vadd.f32 %v1780_v53, %v1588_v29 }
 0x639   :  { %v1208_v27 = vpop.f32.mrf.mxu1  ;;  %1258 = vmax.xlane.f32.xlu0 %v3204_v1 }
 0x63a   :  { %v1209_v17 = vadd.f32 %v1588_v29, %v1208_v27  ;;  %v3223_v8 = vsel %vm1225_vm1, %v1217_v20, -inf }
 0x63b   :  { %v1781_v30 = vpop.f32.mrf.mxu1  ;;  %1260 = vmax.xlane.f32.xlu1 %v3209_v33 }
 0x63c   :  { %v3214_v22 = vsel %vm1225_vm1, %v1209_v17, -inf  ;;  %v1220_v40 = vadd.f32 %v1781_v30, %v1588_v29 }
 0x63d   :  { %v1211_v5 = vpop.f32.mrf.mxu1  ;;  %1266 = vmax.xlane.f32.xlu0 %v3214_v22 }
 0x63e   :  { %v1212_v36 = vadd.f32 %v1588_v29, %v1211_v5  ;;  %v3229_v54 = vsel %vm1225_vm1, %v1220_v40, -inf }
 0x640   :  { %v3219_v57 = vsel %vm1225_vm1, %v1212_v36, -inf }
 0x641   :  { %1268 = vmax.xlane.f32.xlu1 %v3219_v57  ;;  %1270 = vmax.xlane.f32.xlu0 %v3223_v8 }
 0x645   :  { %1272 = vmax.xlane.f32.xlu1 %v3229_v54 }
 0x6ac   :  { %v1247_v45 = vpop.xlane.xlu1 %1246 }
 0x6ad   :  { %v3232_v50 = vsub.f32 %v1228_v19, %v1247_v45 }
 0x6ae   :  { %v1243_v6 = vpop.xlane.xlu0 %1242 }
 0x6af   :  { %v1294_v48 = vmul.f32 1.442695, %v3232_v50  ;;  %v3235_v11 = vsub.f32 %v1226_v41, %v1243_v6 }
 0x6b0   :  { %v1249_v52 = vpop.xlane.xlu1 %1248 }
 0x6b1   :  { %2108 = vpow2.f32 %v1294_v48  ;;  %v1290_v25 = vmul.f32 1.442695, %v3235_v11  ;;  %v3238_v35 = vsub.f32 %v1229_v0, %v1249_v52 }
 0x6b2   :  { %v1245_v26 = vpop.xlane.xlu0 %1244 }
 0x6b3   :  { %v1296_v10 = vmul.f32 1.442695, %v3238_v35  ;;  %v3241_v28 = vsub.f32 %v1227_v13, %v1245_v26  ;;  %2110 = vpow2.f32 %v1290_v25 }
 0x6b5   :  { %2112 = vpow2.f32 %v1296_v10  ;;  %v1292_v15 = vmul.f32 1.442695, %v3241_v28 }
 0x6b6   :  { %v1255_v51 = vpop.xlane.xlu0 %1254 }
 0x6b7   :  { %v3244_v16 = vsub.f32 %v1232_v38, %v1255_v51  ;;  %2114 = vpow2.f32 %v1292_v15 }
 0x6b8   :  { %v1257_v23 = vpop.xlane.xlu1 %1256 }
 0x6b9   :  { %v1302_v29 = vmul.f32 1.442695, %v3244_v16  ;;  %v3247_v37 = vsub.f32 %v1233_v2, %v1257_v23 }
 0x6ba   :  { %v1251_v43 = vpop.xlane.xlu0 %1250 }
 0x6bb   :  { %2116 = vpow2.f32 %v1302_v29  ;;  %v1304_v32 = vmul.f32 1.442695, %v3247_v37  ;;  %v3250_v12 = vsub.f32 %v1230_v58, %v1251_v43 }
 0x6bc   :  { %v1253_v19 = vpop.xlane.xlu1 %1252 }
 0x6bd   :  { %2118 = vpow2.f32 %v1304_v32  ;;  %v1298_v7 = vmul.f32 1.442695, %v3250_v12  ;;  %v3253_v49 = vsub.f32 %v1231_v56, %v1253_v19 }
 0x6be   :  { %v2109_v41 = vpop.eup %2108  ;;  %v1263_v14 = vpop.xlane.xlu0 %1262 }
 0x6bf   :  { %2120 = vpow2.f32 %v1298_v7  ;;  %v1300_v42 = vmul.f32 1.442695, %v3253_v49  ;;  %v3256_v0 = vsub.f32 %v1236_v55, %v1263_v14  ;;  %1326 = vadd.xlane.f32.xlu0 %v2109_v41 }
 0x6c0   :  { %v1265_v9 = vpop.xlane.xlu1 %1264  ;;  %v2111_v18 = vpop.eup %2110 }
 0x6c1   :  { %2122 = vpow2.f32 %v1300_v42  ;;  %v1310_v13 = vmul.f32 1.442695, %v3256_v0  ;;  %v3259_v44 = vsub.f32 %v1237_v46, %v1265_v9 }
 0x6c2   :  { %v2113_v24 = vpop.eup %2112  ;;  %v1259_v62 = vpop.xlane.xlu0 %1258 }
 0x6c3   :  { %2124 = vpow2.f32 %v1310_v13  ;;  %v1312_v63 = vmul.f32 1.442695, %v3259_v44  ;;  %v3263_v38 = vsub.f32 %v3204_v1, %v1259_v62  ;;  %1328 = vadd.xlane.f32.xlu1 %v2113_v24  ;;  %1322 = vadd.xlane.f32.xlu0 %v2111_v18 }
 0x6c4   :  { %v1261_v3 = vpop.xlane.xlu1 %1260  ;;  %v2115_v34 = vpop.eup %2114 }
 0x6c5   :  { %2126 = vpow2.f32 %v1312_v63  ;;  %v1306_v31 = vmul.f32 1.442695, %v3263_v38  ;;  %v3267_v2 = vsub.f32 %v3209_v33, %v1261_v3 }
 0x6c6   :  { %v1267_v39 = vpop.xlane.xlu0 %1266 }
 0x6c7   :  { %2128 = vpow2.f32 %v1306_v31  ;;  %v1308_v58 = vmul.f32 1.442695, %v3267_v2  ;;  %v3271_v60 = vsub.f32 %v3214_v22, %v1267_v39  ;;  %1324 = vadd.xlane.f32.xlu1 %v2115_v34 }
 0x6c8   :  { %v2117_v56 = vpop.eup %2116 }
 0x6c9   :  { %2130 = vpow2.f32 %v1308_v58  ;;  %v1314_v59 = vmul.f32 1.442695, %v3271_v60  ;;  %1334 = vadd.xlane.f32.xlu0 %v2117_v56 }
 0x6ca   :  { %v2119_v61 = vpop.eup %2118  ;;  %v1269_v21 = vpop.xlane.xlu1 %1268 }
 0x6cb   :  { %v1271_v55 = vpop.xlane.xlu0 %1270  ;;  %2132 = vpow2.f32 %v1314_v59  ;;  %v3275_v47 = vsub.f32 %v3219_v57, %v1269_v21  ;;  %1336 = vadd.xlane.f32.xlu1 %v2119_v61 }
 0x6cc   :  { %v3278_v4 = vsub.f32 %v3223_v8, %v1271_v55  ;;  %v2121_v46 = vpop.eup %2120 }
 0x6cd   :  { %v1316_v53 = vmul.f32 1.442695, %v3275_v47  ;;  %1330 = vadd.xlane.f32.xlu0 %v2121_v46 }
 0x6ce   :  { %v1318_v1 = vmul.f32 1.442695, %v3278_v4  ;;  %v2123_v27 = vpop.eup %2122  ;;  %v1273_v17 = vpop.xlane.xlu1 %1272 }
 0x6cf   :  { %2134 = vpow2.f32 %v1316_v53  ;;  %v3283_v33 = vsub.f32 %v3229_v54, %v1273_v17  ;;  %1332 = vadd.xlane.f32.xlu1 %v2123_v27 }
 0x6d0   :  { %v2125_v30 = vpop.eup %2124  ;;  %2136 = vpow2.f32 %v1318_v1 }
 0x6d1   :  { %v1320_v20 = vmul.f32 1.442695, %v3283_v33  ;;  %1342 = vadd.xlane.f32.xlu0 %v2125_v30 }
 0x6d2   :  { %v2127_v22 = vpop.eup %2126 }
 0x6d3   :  { %2138 = vpow2.f32 %v1320_v20  ;;  %1344 = vadd.xlane.f32.xlu1 %v2127_v22 }
 0x6d4   :  { %v2129_v5 = vpop.eup %2128 }
 0x6d5   :  { %1338 = vadd.xlane.f32.xlu0 %v2129_v5 }
 0x6d6   :  { %v2131_v36 = vpop.eup %2130 }
 0x6d7   :  { %1340 = vadd.xlane.f32.xlu1 %v2131_v36 }
 0x6d8   :  { %v2133_v40 = vpop.eup %2132 }
 0x6d9   :  { %1346 = vadd.xlane.f32.xlu0 %v2133_v40 }
 0x6dc   :  { %v2135_v57 = vpop.eup %2134 }
 0x6dd   :  { %v2137_v8 = vpop.eup %2136  ;;  %1348 = vadd.xlane.f32.xlu1 %v2135_v57 }
 0x6de   :  { %1350 = vadd.xlane.f32.xlu0 %v2137_v8 }
 0x6e0   :  { %v2139_v54 = vpop.eup %2138 }
 0x6e1   :  { %1352 = vadd.xlane.f32.xlu1 %v2139_v54 }
 0x748   :  { %v1327_v45 = vpop.xlane.xlu0 %1326 }
 0x749   :  { %2140 = vlog2.f32 %v1327_v45 }
 0x74c   :  { %v1329_v6 = vpop.xlane.xlu1 %1328  ;;  %v1323_v48 = vpop.xlane.xlu0 %1322 }
 0x74d   :  { %2142 = vlog2.f32 %v1329_v6 }
 0x74e   :  { %2144 = vlog2.f32 %v1323_v48 }
 0x750   :  { %v1325_v52 = vpop.xlane.xlu1 %1324 }
 0x751   :  { %2146 = vlog2.f32 %v1325_v52 }
 0x752   :  { %v1335_v25 = vpop.xlane.xlu0 %1334 }
 0x753   :  { %2148 = vlog2.f32 %v1335_v25 }
 0x754   :  { %v1337_v26 = vpop.xlane.xlu1 %1336 }
 0x755   :  { %2150 = vlog2.f32 %v1337_v26 }
 0x756   :  { %v2141_v10 = vpop.eup %2140  ;;  %v1331_v15 = vpop.xlane.xlu0 %1330 }
 0x757   :  { %v1359_v51 = vmul.f32 0.6931472, %v2141_v10  ;;  %2152 = vlog2.f32 %v1331_v15 }
 0x758   :  { %v1333_v23 = vpop.xlane.xlu1 %1332 }
 0x759   :  { %v1388_v29 = vsub.f32 %v3232_v50, %v1359_v51  ;;  %2154 = vlog2.f32 %v1333_v23 }
 0x75a   :  { %v2143_v43 = vpop.eup %2142  ;;  %v1343_v32 = vpop.xlane.xlu0 %1342 }
 0x75b   :  { %v2145_v19 = vpop.eup %2144  ;;  %1404 = vst [vmem:[%s3355_s9 + $0x10] sm:$0xff] %v1388_v29  ;;  %v1361_v7 = vmul.f32 0.6931472, %v2143_v43  ;;  %2156 = vlog2.f32 %v1343_v32 }
 0x75c   :  { %v1355_v41 = vmul.f32 0.6931472, %v2145_v19  ;;  %v1345_v14 = vpop.xlane.xlu1 %1344 }
 0x75d   :  { %v1389_v42 = vsub.f32 %v3238_v35, %v1361_v7  ;;  %2158 = vlog2.f32 %v1345_v14 }
 0x75e   :  { %v2147_v9 = vpop.eup %2146  ;;  %v1386_v18 = vsub.f32 %v3235_v11, %v1355_v41  ;;  %v1339_v13 = vpop.xlane.xlu0 %1338 }
 0x75f   :  { %1405 = vst [vmem:[%s3355_s9 + $0x18] sm:$0xff] %v1389_v42  ;;  %v1357_v50 = vmul.f32 0.6931472, %v2147_v9  ;;  %2160 = vlog2.f32 %v1339_v13 }
 0x760   :  { %v2149_v24 = vpop.eup %2148  ;;  %1402 = vst [vmem:[%s3355_s9] sm:$0xff] %v1386_v18  ;;  %v1341_v62 = vpop.xlane.xlu1 %1340 }
 0x761   :  { %v1387_v63 = vsub.f32 %v3241_v28, %v1357_v50  ;;  %v1367_v35 = vmul.f32 0.6931472, %v2149_v24  ;;  %2162 = vlog2.f32 %v1341_v62 }
 0x762   :  { %v2151_v3 = vpop.eup %2150  ;;  %v1347_v31 = vpop.xlane.xlu0 %1346 }
 0x763   :  { %1403 = vst [vmem:[%s3355_s9 + $0x8] sm:$0xff] %v1387_v63  ;;  %v1392_v11 = vsub.f32 %v3244_v16, %v1367_v35  ;;  %v1369_v34 = vmul.f32 0.6931472, %v2151_v3  ;;  %2164 = vlog2.f32 %v1347_v31 }
 0x764   :  { %v2153_v39 = vpop.eup %2152 }
 0x765   :  { %1408 = vst [vmem:[%s3355_s9 + $0x30] sm:$0xff] %v1392_v11  ;;  %v1393_v58 = vsub.f32 %v3247_v37, %v1369_v34  ;;  %v1363_v28 = vmul.f32 0.6931472, %v2153_v39 }
 0x766   :  { %v2155_v56 = vpop.eup %2154  ;;  %v1349_v59 = vpop.xlane.xlu1 %1348 }
 0x767   :  { %1409 = vst [vmem:[%s3355_s9 + $0x38] sm:$0xff] %v1393_v58  ;;  %v1390_v61 = vsub.f32 %v3250_v12, %v1363_v28  ;;  %v1365_v21 = vmul.f32 0.6931472, %v2155_v56  ;;  %2166 = vlog2.f32 %v1349_v59  ;;  %v1351_v16 = vpop.xlane.xlu0 %1350 }
 0x768   :  { %v2157_v55 = vpop.eup %2156  ;;  %2168 = vlog2.f32 %v1351_v16 }
 0x769   :  { %1406 = vst [vmem:[%s3355_s9 + $0x20] sm:$0xff] %v1390_v61  ;;  %v1391_v37 = vsub.f32 %v3253_v49, %v1365_v21  ;;  %v1375_v46 = vmul.f32 0.6931472, %v2157_v55 }
 0x76a   :  { %v2159_v53 = vpop.eup %2158  ;;  %v1353_v1 = vpop.xlane.xlu1 %1352 }
 0x76b   :  { %1407 = vst [vmem:[%s3355_s9 + $0x28] sm:$0xff] %v1391_v37  ;;  %v1396_v12 = vsub.f32 %v3256_v0, %v1375_v46  ;;  %v1377_v27 = vmul.f32 0.6931472, %v2159_v53  ;;  %2170 = vlog2.f32 %v1353_v1 }
 0x76c   :  { %v2161_v17 = vpop.eup %2160 }
 0x76d   :  { %1412 = vst [vmem:[%s3355_s9 + $0x50] sm:$0xff] %v1396_v12  ;;  %v1397_v30 = vsub.f32 %v3259_v44, %v1377_v27  ;;  %v1371_v20 = vmul.f32 0.6931472, %v2161_v17 }
 0x76e   :  { %v2163_v49 = vpop.eup %2162 }
 0x76f   :  { %1413 = vst [vmem:[%s3355_s9 + $0x58] sm:$0xff] %v1397_v30  ;;  %v1394_v22 = vsub.f32 %v3263_v38, %v1371_v20  ;;  %v1373_v5 = vmul.f32 0.6931472, %v2163_v49 }
 0x770   :  { %v2165_v36 = vpop.eup %2164 }
 0x771   :  { %1410 = vst [vmem:[%s3355_s9 + $0x40] sm:$0xff] %v1394_v22  ;;  %v1395_v0 = vsub.f32 %v3267_v2, %v1373_v5  ;;  %v1379_v40 = vmul.f32 0.6931472, %v2165_v36 }
 0x773   :  { %1411 = vst [vmem:[%s3355_s9 + $0x48] sm:$0xff] %v1395_v0  ;;  %v1398_v44 = vsub.f32 %v3271_v60, %v1379_v40 }
 0x774   :  { %v2167_v57 = vpop.eup %2166 }
 0x775   :  { %v2169_v8 = vpop.eup %2168  ;;  %1414 = vst [vmem:[%s3355_s9 + $0x60] sm:$0xff] %v1398_v44  ;;  %v1381_v38 = vmul.f32 0.6931472, %v2167_v57 }
 0x776   :  { %v1383_v54 = vmul.f32 0.6931472, %v2169_v8 }
 0x777   :  { %v1399_v45 = vsub.f32 %v3275_v47, %v1381_v38 }
 0x778   :  { %v2171_v6 = vpop.eup %2170  ;;  %v1400_v2 = vsub.f32 %v3278_v4, %v1383_v54 }
 0x779   :  { %1415 = vst [vmem:[%s3355_s9 + $0x68] sm:$0xff] %v1399_v45  ;;  %v1385_v48 = vmul.f32 0.6931472, %v2171_v6 }
 0x77a   :  { %1416 = vst [vmem:[%s3355_s9 + $0x70] sm:$0xff] %v1400_v2 }
 0x77b   :  { %v1401_v60 = vsub.f32 %v3283_v33, %v1385_v48 }
 0x77d   :  { %1417 = vst [vmem:[%s3355_s9 + $0x78] sm:$0xff] %v1401_v60 }

</bundles_post_ra>
